<compile_context>
chip_gen: v7x
topology: tpu7x:2x2x1
jax: 0.10.0
libtpu: 0.0.40
codegen_flags: <defaults>
</compile_context>

<pallas_src>
import jax
import jax.numpy as jnp
from jax.experimental import pallas as pl
from jax.experimental.pallas import tpu as pltpu


# ----------------------------- Pallas kernel ------------------------------ #
def deepfm_kernel(
    emb1s_ref,   # (TM, 1)      f32   pre-summed 1-d embeddings
    emb2_ref,    # (TM, C*E)    bf16  flat 2-d embeddings
    nfeat_ref,   # (TM, Fn)     f32   numerical features
    seg_ref,     # (C*E, E)     bf16  0/1 segment-sum matrix
    w1d_ref,     # (1, Fn)      f32   dense_1d weight (row)
    b1d_ref,     # (1, 1)       f32
    w1e_ref,     # (C*E, H1)    bf16  dnn layer 1 weight (embedding part)
    w1n_ref,     # (Fn, H1)     bf16  dnn layer 1 weight (numerical part)
    b1_ref,      # (1, H1)      f32
    w2_ref,      # (H1, H2)     bf16  dnn layer 2 weight
    b2_ref,      # (1, H2)      f32
    wo_h_ref,    # (H2, Dout)   bf16  output weight rows 2..129 (K=128)
    wo_fm_ref,   # (2, Dout)    f32   output weight rows 0..1 (fm1, fm2)
    bo_ref,      # (1, Dout)    f32
    out_ref,     # (TM, Dout)   f32
):
    f32 = jnp.float32
    bf16 = jnp.bfloat16

    nfeat = nfeat_ref[...]                       # (TM, Fn)  f32
    emb_bf = emb2_ref[...]                       # (TM, C*E) bf16
    emb_f = emb_bf.astype(f32)

    # ---- FM first-order (VPU reduce, no N=1 matmul) ----------------------- #
    fm1 = (
        emb1s_ref[...]
        + jnp.sum(nfeat * w1d_ref[...], axis=1, keepdims=True)
        + b1d_ref[...]
    )                                            # (TM, 1)

    # ---- FM second-order (segment-sum matmul on MXU from flat layout) ----- #
    # sum_embed[m, e] = sum_c emb[m, c, e]
    sum_embed = jnp.dot(emb_bf, seg_ref[...], preferred_element_type=f32)  # (TM, E)
    # sum_e sum_square_embed[m, e] == sum over all C*E of emb^2
    fm2 = 0.5 * (
        jnp.sum(sum_embed * sum_embed, axis=-1, keepdims=True)
        - jnp.sum(emb_f * emb_f, axis=-1, keepdims=True)
    )                                            # (TM, 1)

    # ---- DNN (split-K matmul instead of lane-misaligned concat) ----------- #
    h1 = jnp.dot(emb_bf, w1e_ref[...], preferred_element_type=f32)
    h1 = h1 + jnp.dot(nfeat.astype(bf16), w1n_ref[...], preferred_element_type=f32)
    h1 = jnp.maximum(h1 + b1_ref[...], 0.0)      # (TM, H1)
    h2 = jnp.maximum(
        jnp.dot(h1.astype(bf16), w2_ref[...], preferred_element_type=f32)
        + b2_ref[...],
        0.0,
    )                                            # (TM, H2)

    # ---- Output MLP (exact K=128 matmul + two VPU broadcast-MACs) ---------- #
    wo_fm = wo_fm_ref[...]                       # (2, Dout) f32
    out = jnp.dot(h2.astype(bf16), wo_h_ref[...], preferred_element_type=f32)
    out = out + fm1 * wo_fm[0:1, :] + fm2 * wo_fm[1:2, :] + bo_ref[...]
    out_ref[...] = jnp.maximum(out, 0.0).astype(out_ref.dtype)


# ------------------------------ Wrapper ------------------------------------#
def deepfm_forward(n_features, c_features, params, *, tm=256):
    """n_features: (B, G, Fn) float32; c_features: (B, G, C) int32."""
    B, G, Fn = n_features.shape
    C = c_features.shape[2]
    E = params["emb2_tables"][0].shape[1]
    H1 = params["w_dnn1"].shape[1]
    H2 = params["w_dnn2"].shape[1]
    Dout = params["w_out"].shape[1]
    M = B * G

    # --- fused embedding gather: one concatenated table, one gather --------- #
    sizes = [t.shape[0] for t in params["emb2_tables"]]
    offs, acc = [], 0
    for s in sizes:
        offs.append(acc)
        acc += s
    offsets = jnp.asarray(offs, jnp.int32)                       # (C,)
    table1 = jnp.concatenate(params["emb1_tables"], axis=0)      # (V, 1)
    table2 = jnp.concatenate(params["emb2_tables"], axis=0)      # (V, E)

    flat_idx = c_features.astype(jnp.int32) + offsets[None, None, :]  # (B,G,C)
    emb1 = table1[flat_idx][..., 0]                              # (B,G,C)
    emb2 = table2[flat_idx]                                      # (B,G,C,E)

    emb1_sum = jnp.sum(emb1, axis=2).reshape(M, 1).astype(jnp.float32)
    emb2_flat = emb2.reshape(M, C * E).astype(jnp.bfloat16)
    nfeat = n_features.reshape(M, Fn).astype(jnp.float32)

    # --- pad rows to a multiple of the (large) row tile --------------------- #
    tm = max(8, tm)
    M_pad = ((M + tm - 1) // tm) * tm
    if M_pad != M:
        pad = M_pad - M
        emb1_sum = jnp.pad(emb1_sum, ((0, pad), (0, 0)))
        emb2_flat = jnp.pad(emb2_flat, ((0, pad), (0, 0)))
        nfeat = jnp.pad(nfeat, ((0, pad), (0, 0)))

    # --- 0/1 segment-sum matrix: seg[c*E + e, e2] = (e == e2) --------------- #
    seg = (
        jax.lax.broadcasted_iota(jnp.int32, (C * E, E), 0) % E
        == jax.lax.broadcasted_iota(jnp.int32, (C * E, E), 1)
    ).astype(jnp.bfloat16)

    # --- weight preprocessing (splits + bf16 casts) -------------------------- #
    w1d_row = params["w1d"].reshape(1, Fn).astype(jnp.float32)
    b1d = params["b1d"].astype(jnp.float32)
    w1e = params["w_dnn1"][: C * E].astype(jnp.bfloat16)         # (C*E, H1)
    w1n = params["w_dnn1"][C * E:].astype(jnp.bfloat16)          # (Fn, H1)
    b1 = params["b_dnn1"].astype(jnp.float32)
    w2 = params["w_dnn2"].astype(jnp.bfloat16)                   # (H1, H2)
    b2 = params["b_dnn2"].astype(jnp.float32)
    wo_h = params["w_out"][2:].astype(jnp.bfloat16)              # (H2, Dout)
    wo_fm = params["w_out"][:2].astype(jnp.float32)              # (2, Dout)
    bo = params["b_out"].astype(jnp.float32)

    grid = (M_pad // tm,)
    row = lambda i: (i, 0)
    full = lambda i: (0, 0)

    in_specs = [
        pl.BlockSpec((tm, 1), row),           # emb1_sum
        pl.BlockSpec((tm, C * E), row),       # emb2_flat (bf16)
        pl.BlockSpec((tm, Fn), row),          # nfeat
        pl.BlockSpec((C * E, E), full),       # seg
        pl.BlockSpec((1, Fn), full),          # w1d_row
        pl.BlockSpec((1, 1), full),           # b1d
        pl.BlockSpec((C * E, H1), full),      # w1e
        pl.BlockSpec((Fn, H1), full),         # w1n
        pl.BlockSpec((1, H1), full),          # b1
        pl.BlockSpec((H1, H2), full),         # w2
        pl.BlockSpec((1, H2), full),          # b2
        pl.BlockSpec((H2, Dout), full),       # wo_h
        pl.BlockSpec((2, Dout), full),        # wo_fm
        pl.BlockSpec((1, Dout), full),        # bo
    ]
    out_spec = pl.BlockSpec((tm, Dout), row)

    out = pl.pallas_call(
        deepfm_kernel,
        out_shape=jax.ShapeDtypeStruct((M_pad, Dout), jnp.float32),
        grid_spec=pltpu.PrefetchScalarGridSpec(
            num_scalar_prefetch=0,
            grid=grid,
            in_specs=in_specs,
            out_specs=out_spec,
        ),
        compiler_params=pltpu.CompilerParams(
            dimension_semantics=("parallel",)
        ),
    )(
        emb1_sum, emb2_flat, nfeat, seg,
        w1d_row, b1d,
        w1e, w1n, b1,
        w2, b2,
        wo_h, wo_fm, bo,
    )
    return out[:M].reshape(B, G, Dout)


# --------------------------- Parameter init --------------------------------#
def init_params(key, c_sizes, fea_n, fea_c, emb_size=16, output_size=128):
    keys = iter(jax.random.split(key, 4 * len(c_sizes) + 16))

    def xavier(k, shape):
        fan_in, fan_out = shape[0], shape[-1]
        limit = (6.0 / (fan_in + fan_out)) ** 0.5
        return jax.random.uniform(k, shape, jnp.float32, -limit, limit)

    params = {}
    params["emb1_tables"] = [xavier(next(keys), (s, 1)) for s in c_sizes]
    params["emb2_tables"] = [xavier(next(keys), (s, emb_size)) for s in c_sizes]

    params["w1d"] = xavier(next(keys), (fea_n, 1))
    params["b1d"] = jnp.zeros((1, 1), jnp.float32)

    d0 = fea_c * emb_size + fea_n
    params["w_dnn1"] = xavier(next(keys), (d0, 256))
    params["b_dnn1"] = jnp.zeros((1, 256), jnp.float32)
    params["w_dnn2"] = xavier(next(keys), (256, 128))
    params["b_dnn2"] = jnp.zeros((1, 128), jnp.float32)

    params["w_out"] = xavier(next(keys), (130, output_size))
    params["b_out"] = jnp.zeros((1, output_size), jnp.float32)
    return params


# --------------------------- Reference (pure f32 JAX) -----------------------#
def deepfm_reference(n_features, c_features, params):
    B, G, Fn = n_features.shape
    C = c_features.shape[2]
    E = params["emb2_tables"][0].shape[1]

    emb1 = jnp.concatenate(
        [params["emb1_tables"][i][c_features[:, :, i]] for i in range(C)],
        axis=2,
    )                                                           # (B,G,C)
    fm1_sparse = jnp.sum(emb1, axis=2, keepdims=True)
    fm1_dense = n_features @ params["w1d"] + params["b1d"][0]
    fm1 = fm1_sparse + fm1_dense

    emb2 = jnp.stack(
        [params["emb2_tables"][i][c_features[:, :, i]] for i in range(C)],
        axis=2,
    )                                                           # (B,G,C,E)
    sum_embed = jnp.sum(emb2, axis=2)
    sub = 0.5 * (sum_embed * sum_embed - jnp.sum(emb2 * emb2, axis=2))
    fm2 = jnp.sum(sub, axis=2, keepdims=True)

    x = jnp.concatenate([emb2.reshape(B, G, C * E), n_features], axis=2)
    h1 = jnp.maximum(x @ params["w_dnn1"] + params["b_dnn1"][0], 0.0)
    h2 = jnp.maximum(h1 @ params["w_dnn2"] + params["b_dnn2"][0], 0.0)
    point = jnp.concatenate([fm1, fm2, h2], axis=-1)
    return jnp.maximum(point @ params["w_out"] + params["b_out"][0], 0.0)


# --------------------------------- Main -------------------------------------#
if __name__ == "__main__":
    key = jax.random.PRNGKey(0)
    k_par, k_n, k_c = jax.random.split(key, 3)

    # Small, forward-consistent shapes.
    B, G = 2, 8                 # batch, graph_size  -> M = 16 rows
    fea_n = 8                   # numerical features
    c_sizes = [10, 12, 14, 16]  # categorical vocab sizes
    fea_c = len(c_sizes)
    emb_size = 16
    output_size = 128

    params = init_params(k_par, c_sizes, fea_n, fea_c, emb_size, output_size)

    n_features = jax.random.normal(k_n, (B, G, fea_n), jnp.float32)
    c_keys = jax.random.split(k_c, fea_c)
    c_features = jnp.stack(
        [
            jax.random.randint(c_keys[i], (B, G), 0, c_sizes[i], jnp.int32)
            for i in range(fea_c)
        ],
        axis=-1,
    )                                                           # (B, G, fea_c)

    out = deepfm_forward(n_features, c_features, params)
    out = jax.block_until_ready(out)

    ref = deepfm_reference(n_features, c_features, params)
    assert out.shape == (B, G, output_size), out.shape
    # bf16 MXU operands with f32 accumulation -> loosened tolerance vs f32 ref.
    assert jnp.allclose(out, ref, atol=5e-2, rtol=5e-2), (
        float(jnp.max(jnp.abs(out - ref)))
    )

    print("KERNEL_OK")
</pallas_src>

<mosaic_0001>
module attributes {stable_mosaic.version = 11 : i64} {
  func.func @deepfm_kernel(%arg0: i32, %arg1: memref<256x1xf32, #tpu.memory_space<vmem>>, %arg2: memref<256x64xbf16, #tpu.memory_space<vmem>>, %arg3: memref<256x8xf32, #tpu.memory_space<vmem>>, %arg4: memref<64x16xbf16, #tpu.memory_space<vmem>>, %arg5: memref<1x8xf32, #tpu.memory_space<vmem>>, %arg6: memref<1x1xf32, #tpu.memory_space<vmem>>, %arg7: memref<64x256xbf16, #tpu.memory_space<vmem>>, %arg8: memref<8x256xbf16, #tpu.memory_space<vmem>>, %arg9: memref<1x256xf32, #tpu.memory_space<vmem>>, %arg10: memref<256x128xbf16, #tpu.memory_space<vmem>>, %arg11: memref<1x128xf32, #tpu.memory_space<vmem>>, %arg12: memref<128x128xbf16, #tpu.memory_space<vmem>>, %arg13: memref<2x128xf32, #tpu.memory_space<vmem>>, %arg14: memref<1x128xf32, #tpu.memory_space<vmem>>, %arg15: memref<256x128xf32, #tpu.memory_space<vmem>>) attributes {dimension_semantics = [#tpu.dimension_semantics<parallel>], iteration_bounds = array<i64: 1>, scalar_prefetch = 0 : i64, scratch_operands = 0 : i64, tpu.core_type = #tpu.core_type<tc>, window_params = [{transform_indices = @transform_0, window_bounds = array<i64: 256, 1>}, {transform_indices = @transform_1, window_bounds = array<i64: 256, 64>}, {transform_indices = @transform_2, window_bounds = array<i64: 256, 8>}, {pipeline_mode = #tpu.pipeline_mode<synchronous>, transform_indices = @transform_3, window_bounds = array<i64: 64, 16>}, {pipeline_mode = #tpu.pipeline_mode<synchronous>, transform_indices = @transform_4, window_bounds = array<i64: 1, 8>}, {pipeline_mode = #tpu.pipeline_mode<synchronous>, transform_indices = @transform_5, window_bounds = array<i64: 1, 1>}, {pipeline_mode = #tpu.pipeline_mode<synchronous>, transform_indices = @transform_6, window_bounds = array<i64: 64, 256>}, {pipeline_mode = #tpu.pipeline_mode<synchronous>, transform_indices = @transform_7, window_bounds = array<i64: 8, 256>}, {pipeline_mode = #tpu.pipeline_mode<synchronous>, transform_indices = @transform_8, window_bounds = array<i64: 1, 256>}, {pipeline_mode = #tpu.pipeline_mode<synchronous>, transform_indices = @transform_9, window_bounds = array<i64: 256, 128>}, {pipeline_mode = #tpu.pipeline_mode<synchronous>, transform_indices = @transform_10, window_bounds = array<i64: 1, 128>}, {pipeline_mode = #tpu.pipeline_mode<synchronous>, transform_indices = @transform_11, window_bounds = array<i64: 128, 128>}, {pipeline_mode = #tpu.pipeline_mode<synchronous>, transform_indices = @transform_12, window_bounds = array<i64: 2, 128>}, {pipeline_mode = #tpu.pipeline_mode<synchronous>, transform_indices = @transform_13, window_bounds = array<i64: 1, 128>}, {transform_indices = @transform_14, window_bounds = array<i64: 256, 128>}]} {
    %c0 = arith.constant 0 : index
    %c0_0 = arith.constant 0 : index
    %0 = vector.load %arg3[%c0, %c0_0] : memref<256x8xf32, #tpu.memory_space<vmem>>, vector<256x8xf32>
    %c0_1 = arith.constant 0 : index
    %c0_2 = arith.constant 0 : index
    %1 = vector.load %arg2[%c0_1, %c0_2] : memref<256x64xbf16, #tpu.memory_space<vmem>>, vector<256x64xbf16>
    %2 = arith.extf %1 : vector<256x64xbf16> to vector<256x64xf32>
    %c0_3 = arith.constant 0 : index
    %c0_4 = arith.constant 0 : index
    %3 = vector.load %arg1[%c0_3, %c0_4] : memref<256x1xf32, #tpu.memory_space<vmem>>, vector<256x1xf32>
    %c0_5 = arith.constant 0 : index
    %c0_6 = arith.constant 0 : index
    %4 = vector.load %arg5[%c0_5, %c0_6] : memref<1x8xf32, #tpu.memory_space<vmem>>, vector<1x8xf32>
    %5 = vector.broadcast %4 : vector<1x8xf32> to vector<256x8xf32>
    %6 = arith.mulf %0, %5 : vector<256x8xf32>
    %cst = arith.constant dense<0.000000e+00> : vector<256xf32>
    %7 = vector.multi_reduction <add>, %6, %cst [1] : vector<256x8xf32> to vector<256xf32>
    %8 = vector.shape_cast %7 : vector<256xf32> to vector<256x1xf32>
    %9 = arith.addf %3, %8 : vector<256x1xf32>
    %c0_7 = arith.constant 0 : index
    %c0_8 = arith.constant 0 : index
    %10 = vector.load %arg6[%c0_7, %c0_8] : memref<1x1xf32, #tpu.memory_space<vmem>>, vector<1x1xf32>
    %11 = vector.broadcast %10 : vector<1x1xf32> to vector<256x1xf32>
    %12 = arith.addf %9, %11 : vector<256x1xf32>
    %c0_9 = arith.constant 0 : index
    %c0_10 = arith.constant 0 : index
    %13 = vector.load %arg4[%c0_9, %c0_10] : memref<64x16xbf16, #tpu.memory_space<vmem>>, vector<64x16xbf16>
    %cst_11 = arith.constant dense<0.000000e+00> : vector<256x16xf32>
    %14 = tpu.matmul %1, %13, %cst_11 {dimension_numbers = #tpu.dot_dimension_numbers<[1], [0], [0], [1], [0, 0, 1, 1], [], []>} : vector<256x64xbf16>, vector<64x16xbf16>, vector<256x16xf32> -> vector<256x16xf32>
    %15 = arith.mulf %14, %14 : vector<256x16xf32>
    %cst_12 = arith.constant dense<0.000000e+00> : vector<256xf32>
    %16 = vector.multi_reduction <add>, %15, %cst_12 [1] : vector<256x16xf32> to vector<256xf32>
    %17 = vector.shape_cast %16 : vector<256xf32> to vector<256x1xf32>
    %18 = arith.mulf %2, %2 : vector<256x64xf32>
    %cst_13 = arith.constant dense<0.000000e+00> : vector<256xf32>
    %19 = vector.multi_reduction <add>, %18, %cst_13 [1] : vector<256x64xf32> to vector<256xf32>
    %20 = vector.shape_cast %19 : vector<256xf32> to vector<256x1xf32>
    %21 = arith.subf %17, %20 : vector<256x1xf32>
    %cst_14 = arith.constant 5.000000e-01 : f32
    %22 = vector.broadcast %cst_14 : f32 to vector<256x1xf32>
    %23 = arith.mulf %22, %21 : vector<256x1xf32>
    %c0_15 = arith.constant 0 : index
    %c0_16 = arith.constant 0 : index
    %24 = vector.load %arg7[%c0_15, %c0_16] : memref<64x256xbf16, #tpu.memory_space<vmem>>, vector<64x256xbf16>
    %cst_17 = arith.constant dense<0.000000e+00> : vector<256x256xf32>
    %25 = tpu.matmul %1, %24, %cst_17 {dimension_numbers = #tpu.dot_dimension_numbers<[1], [0], [0], [1], [0, 0, 1, 1], [], []>} : vector<256x64xbf16>, vector<64x256xbf16>, vector<256x256xf32> -> vector<256x256xf32>
    %26 = arith.truncf %0 : vector<256x8xf32> to vector<256x8xbf16>
    %c0_18 = arith.constant 0 : index
    %c0_19 = arith.constant 0 : index
    %27 = vector.load %arg8[%c0_18, %c0_19] : memref<8x256xbf16, #tpu.memory_space<vmem>>, vector<8x256xbf16>
    %cst_20 = arith.constant dense<0.000000e+00> : vector<256x256xf32>
    %28 = tpu.matmul %26, %27, %cst_20 {dimension_numbers = #tpu.dot_dimension_numbers<[1], [0], [0], [1], [0, 0, 1, 1], [], []>} : vector<256x8xbf16>, vector<8x256xbf16>, vector<256x256xf32> -> vector<256x256xf32>
    %29 = arith.addf %25, %28 : vector<256x256xf32>
    %c0_21 = arith.constant 0 : index
    %c0_22 = arith.constant 0 : index
    %30 = vector.load %arg9[%c0_21, %c0_22] : memref<1x256xf32, #tpu.memory_space<vmem>>, vector<1x256xf32>
    %31 = vector.broadcast %30 : vector<1x256xf32> to vector<256x256xf32>
    %32 = arith.addf %29, %31 : vector<256x256xf32>
    %cst_23 = arith.constant 0.000000e+00 : f32
    %33 = vector.broadcast %cst_23 : f32 to vector<256x256xf32>
    %34 = arith.maximumf %32, %33 : vector<256x256xf32>
    %35 = arith.truncf %34 : vector<256x256xf32> to vector<256x256xbf16>
    %c0_24 = arith.constant 0 : index
    %c0_25 = arith.constant 0 : index
    %36 = vector.load %arg10[%c0_24, %c0_25] : memref<256x128xbf16, #tpu.memory_space<vmem>>, vector<256x128xbf16>
    %cst_26 = arith.constant dense<0.000000e+00> : vector<256x128xf32>
    %37 = tpu.matmul %35, %36, %cst_26 {dimension_numbers = #tpu.dot_dimension_numbers<[1], [0], [0], [1], [0, 0, 1, 1], [], []>} : vector<256x256xbf16>, vector<256x128xbf16>, vector<256x128xf32> -> vector<256x128xf32>
    %c0_27 = arith.constant 0 : index
    %c0_28 = arith.constant 0 : index
    %38 = vector.load %arg11[%c0_27, %c0_28] : memref<1x128xf32, #tpu.memory_space<vmem>>, vector<1x128xf32>
    %39 = vector.broadcast %38 : vector<1x128xf32> to vector<256x128xf32>
    %40 = arith.addf %37, %39 : vector<256x128xf32>
    %cst_29 = arith.constant 0.000000e+00 : f32
    %41 = vector.broadcast %cst_29 : f32 to vector<256x128xf32>
    %42 = arith.maximumf %40, %41 : vector<256x128xf32>
    %c0_30 = arith.constant 0 : index
    %c0_31 = arith.constant 0 : index
    %43 = vector.load %arg13[%c0_30, %c0_31] : memref<2x128xf32, #tpu.memory_space<vmem>>, vector<2x128xf32>
    %44 = arith.truncf %42 : vector<256x128xf32> to vector<256x128xbf16>
    %c0_32 = arith.constant 0 : index
    %c0_33 = arith.constant 0 : index
    %45 = vector.load %arg12[%c0_32, %c0_33] : memref<128x128xbf16, #tpu.memory_space<vmem>>, vector<128x128xbf16>
    %cst_34 = arith.constant dense<0.000000e+00> : vector<256x128xf32>
    %46 = tpu.matmul %44, %45, %cst_34 {dimension_numbers = #tpu.dot_dimension_numbers<[1], [0], [0], [1], [0, 0, 1, 1], [], []>} : vector<256x128xbf16>, vector<128x128xbf16>, vector<256x128xf32> -> vector<256x128xf32>
    %47 = vector.extract_strided_slice %43 {offsets = [0, 0], sizes = [1, 128], strides = [1, 1]} : vector<2x128xf32> to vector<1x128xf32>
    %48 = vector.broadcast %12 : vector<256x1xf32> to vector<256x128xf32>
    %49 = vector.broadcast %47 : vector<1x128xf32> to vector<256x128xf32>
    %50 = arith.mulf %48, %49 : vector<256x128xf32>
    %51 = arith.addf %46, %50 : vector<256x128xf32>
    %52 = vector.extract_strided_slice %43 {offsets = [1, 0], sizes = [1, 128], strides = [1, 1]} : vector<2x128xf32> to vector<1x128xf32>
    %53 = vector.broadcast %23 : vector<256x1xf32> to vector<256x128xf32>
    %54 = vector.broadcast %52 : vector<1x128xf32> to vector<256x128xf32>
    %55 = arith.mulf %53, %54 : vector<256x128xf32>
    %56 = arith.addf %51, %55 : vector<256x128xf32>
    %c0_35 = arith.constant 0 : index
    %c0_36 = arith.constant 0 : index
    %57 = vector.load %arg14[%c0_35, %c0_36] : memref<1x128xf32, #tpu.memory_space<vmem>>, vector<1x128xf32>
    %58 = vector.broadcast %57 : vector<1x128xf32> to vector<256x128xf32>
    %59 = arith.addf %56, %58 : vector<256x128xf32>
    %cst_37 = arith.constant 0.000000e+00 : f32
    %60 = vector.broadcast %cst_37 : f32 to vector<256x128xf32>
    %61 = arith.maximumf %59, %60 : vector<256x128xf32>
    %c0_38 = arith.constant 0 : index
    %c0_39 = arith.constant 0 : index
    %62 = vector.load %arg15[%c0_38, %c0_39] : memref<256x128xf32, #tpu.memory_space<vmem>>, vector<256x128xf32>
    tpu.vector_store %arg15[%c0_38, %c0_39], %61 {strides = array<i32>} : memref<256x128xf32, #tpu.memory_space<vmem>>, vector<256x128xf32>,
    return
  }
  func.func @transform_0(%arg0: i32) -> (i32, i32) {
    %c0_i32 = arith.constant 0 : i32
    %c0_i32_0 = arith.constant 0 : i32
    return %arg0, %c0_i32 : i32, i32
  }
  func.func @transform_1(%arg0: i32) -> (i32, i32) {
    %c0_i32 = arith.constant 0 : i32
    %c0_i32_0 = arith.constant 0 : i32
    return %arg0, %c0_i32 : i32, i32
  }
  func.func @transform_2(%arg0: i32) -> (i32, i32) {
    %c0_i32 = arith.constant 0 : i32
    %c0_i32_0 = arith.constant 0 : i32
    return %arg0, %c0_i32 : i32, i32
  }
  func.func @transform_3(%arg0: i32) -> (i32, i32) {
    %c0_i32 = arith.constant 0 : i32
    %c0_i32_0 = arith.constant 0 : i32
    %c0_i32_1 = arith.constant 0 : i32
    return %c0_i32, %c0_i32_0 : i32, i32
  }
  func.func @transform_4(%arg0: i32) -> (i32, i32) {
    %c0_i32 = arith.constant 0 : i32
    %c0_i32_0 = arith.constant 0 : i32
    %c0_i32_1 = arith.constant 0 : i32
    return %c0_i32, %c0_i32_0 : i32, i32
  }
  func.func @transform_5(%arg0: i32) -> (i32, i32) {
    %c0_i32 = arith.constant 0 : i32
    %c0_i32_0 = arith.constant 0 : i32
    %c0_i32_1 = arith.constant 0 : i32
    return %c0_i32, %c0_i32_0 : i32, i32
  }
  func.func @transform_6(%arg0: i32) -> (i32, i32) {
    %c0_i32 = arith.constant 0 : i32
    %c0_i32_0 = arith.constant 0 : i32
    %c0_i32_1 = arith.constant 0 : i32
    return %c0_i32, %c0_i32_0 : i32, i32
  }
  func.func @transform_7(%arg0: i32) -> (i32, i32) {
    %c0_i32 = arith.constant 0 : i32
    %c0_i32_0 = arith.constant 0 : i32
    %c0_i32_1 = arith.constant 0 : i32
    return %c0_i32, %c0_i32_0 : i32, i32
  }
  func.func @transform_8(%arg0: i32) -> (i32, i32) {
    %c0_i32 = arith.constant 0 : i32
    %c0_i32_0 = arith.constant 0 : i32
    %c0_i32_1 = arith.constant 0 : i32
    return %c0_i32, %c0_i32_0 : i32, i32
  }
  func.func @transform_9(%arg0: i32) -> (i32, i32) {
    %c0_i32 = arith.constant 0 : i32
    %c0_i32_0 = arith.constant 0 : i32
    %c0_i32_1 = arith.constant 0 : i32
    return %c0_i32, %c0_i32_0 : i32, i32
  }
  func.func @transform_10(%arg0: i32) -> (i32, i32) {
    %c0_i32 = arith.constant 0 : i32
    %c0_i32_0 = arith.constant 0 : i32
    %c0_i32_1 = arith.constant 0 : i32
    return %c0_i32, %c0_i32_0 : i32, i32
  }
  func.func @transform_11(%arg0: i32) -> (i32, i32) {
    %c0_i32 = arith.constant 0 : i32
    %c0_i32_0 = arith.constant 0 : i32
    %c0_i32_1 = arith.constant 0 : i32
    return %c0_i32, %c0_i32_0 : i32, i32
  }
  func.func @transform_12(%arg0: i32) -> (i32, i32) {
    %c0_i32 = arith.constant 0 : i32
    %c0_i32_0 = arith.constant 0 : i32
    %c0_i32_1 = arith.constant 0 : i32
    return %c0_i32, %c0_i32_0 : i32, i32
  }
  func.func @transform_13(%arg0: i32) -> (i32, i32) {
    %c0_i32 = arith.constant 0 : i32
    %c0_i32_0 = arith.constant 0 : i32
    %c0_i32_1 = arith.constant 0 : i32
    return %c0_i32, %c0_i32_0 : i32, i32
  }
  func.func @transform_14(%arg0: i32) -> (i32, i32) {
    %c0_i32 = arith.constant 0 : i32
    %c0_i32_0 = arith.constant 0 : i32
    return %arg0, %c0_i32 : i32, i32
  }
}

</mosaic_0001>

<bundles_post_ra>
// kernel: tpu_custom_call.1
= control target key start
LH: loop header
LB: loop body
LE: loop exit
PB: predicated region body
PF: predicated region fallthrough
CT: control target
= control target key end

     0   :  { %s4512_s0 = inlined_call_operand.vmem [shape: f32[256,1], index: 0, kind: input, shape index: {}]   ;;  %s4513_s1 = inlined_call_operand.vmem [shape: bf16[256,64], index: 1, kind: input, shape index: {}]   ;;  %s4514_s2 = inlined_call_operand.vmem [shape: f32[256,8], index: 2, kind: input, shape index: {}]   ;;  %s4515_s3 = inlined_call_operand.vmem [shape: bf16[64,16], index: 3, kind: input, shape index: {}]   ;;  %s4516_s4 = inlined_call_operand.vmem [shape: f32[1,8], index: 4, kind: input, shape index: {}]   ;;  %s4517_s5 = inlined_call_operand.<no memory space> [shape: f32[1,1], index: 5, kind: input, shape index: {}]   ;;  %s4518_s6 = inlined_call_operand.vmem [shape: bf16[64,256], index: 6, kind: input, shape index: {}]   ;;  %s4519_s7 = inlined_call_operand.vmem [shape: bf16[8,256], index: 7, kind: input, shape index: {}]   ;;  %s4520_s8 = inlined_call_operand.vmem [shape: f32[1,256], index: 8, kind: input, shape index: {}]   ;;  %s4521_s9 = inlined_call_operand.vmem [shape: bf16[256,128], index: 9, kind: input, shape index: {}]   ;;  %s4522_s10 = inlined_call_operand.vmem [shape: f32[1,128], index: 10, kind: input, shape index: {}]   ;;  %s4523_s11 = inlined_call_operand.vmem [shape: bf16[128,128], index: 11, kind: input, shape index: {}]   ;;  %s4524_s12 = inlined_call_operand.vmem [shape: f32[2,128], index: 12, kind: input, shape index: {}]   ;;  %s4525_s13 = inlined_call_operand.vmem [shape: f32[1,128], index: 13, kind: input, shape index: {}]   ;;  %s4526_s14 = inlined_call_operand.hbm [shape: f32[256,128], index: 14, kind: output, shape index: {}]  }
   0x1   :  { %v19_v0 = vstv %s4517_s5 }
   0x2   :  { %20 = vst [vmem:[#allocation2] sm:$0x1] %v19_v0 }
   0x3   :  { %v1053_v1 = vld [vmem:[%s4519_s7] sm:$0xff]  ;;  %vm1107_vm0 = vcmask 1043456   ;;  %v3278_v3 = vld [vmem:[%s4514_s2 + $0x8] sm:$0xff]  ;;  %v3185_v6 = vmov 0   ;;  %vm218_vm1 = vcmask 64512   ;;  %v3299_v12 = vld [vmem:[%s4514_s2 + $0x10] sm:$0xff] }
   0x4   :  { %v3273_v2 = vld [vmem:[%s4514_s2] sm:$0xff]  ;;  %v2704_v4 = vcombine.high %v1053_v1, %v1053_v1  ;;  %v2703_v5 = vcombine.low %v1053_v1, %v1053_v1  ;;  %1146 = vmatprep.mubr.bf16.mxu1 %v3185_v6  ;;  %3085 = vset.pattern.permute.xlu1 %v3185_v6  ;;  %v3093_v11 = vld [vmem:[%s4518_s6 + $0x14] ss:$8 sps:$4 sm:$0xff]   ;;  %v3091_v14 = vld [vmem:[%s4518_s6 + $0x10] ss:$8 sps:$4 sm:$0xff]   ;;  %vm498_vm2 = vcmask 523264  }
   0x5   :  { %v3090_v7 = vld [vmem:[%s4518_s6 + $0x4] ss:$8 sps:$4 sm:$0xff]   ;;  %3084 = vset.pattern.permute.xlu0 %v3185_v6  ;;  %v1037_v9 = vpack.c.bf16 %v3278_v3, %v3273_v2  ;;  %v3088_v10 = vld [vmem:[%s4518_s6] ss:$8 sps:$4 sm:$0xff]   ;;  %v3304_v13 = vld [vmem:[%s4514_s2 + $0x18] sm:$0xff] }
   0x6   :  { %2705 = vmatprep.subr.msk.bf16.mxu1 %vm1107_vm0, %v2704_v4  ;;  %v1109_v8 = vsel %vm1107_vm0, %v2703_v5, 0  ;;  %v3096_v15 = vld [vmem:[%s4518_s6 + $0x24] ss:$8 sps:$4 sm:$0xff]   ;;  %v1038_v16 = vpack.c.bf16 %v3304_v13, %v3299_v12  ;;  %v3094_v17 = vld [vmem:[%s4518_s6 + $0x20] ss:$8 sps:$4 sm:$0xff]   ;;  %v3347_v24 = vld [vmem:[%s4514_s2 + $0x30] sm:$0xff] }
   0x7   :  { %1115 = vmatpush1.bf16.msra.mxu1 %v1109_v8  ;;  %v3099_v18 = vld [vmem:[%s4518_s6 + $0x34] ss:$8 sps:$4 sm:$0xff]   ;;  %v3324_v19 = vld [vmem:[%s4514_s2 + $0x20] sm:$0xff]  ;;  %v3330_v20 = vld [vmem:[%s4514_s2 + $0x28] sm:$0xff] }
   0x8   :  { %1347 = vmatprep.subr.bf16.mxu1 %v3090_v7  ;;  %v3097_v21 = vld [vmem:[%s4518_s6 + $0x30] ss:$8 sps:$4 sm:$0xff]   ;;  %v3338_v22 = vld [vmem:[%s4513_s1] sm:$0xff]   ;;  %v1039_v23 = vpack.c.bf16 %v3330_v20, %v3324_v19  ;;  %v3368_v28 = vld [vmem:[%s4514_s2 + $0x48] sm:$0xff] }
   0x9   :  { %2936 = vmatprep.mubr.msk.bf16.mxu0 %vm498_vm2, %v3338_v22  ;;  %v3354_v25 = vld [vmem:[%s4514_s2 + $0x38] sm:$0xff]  ;;  %v3361_v27 = vld [vmem:[%s4514_s2 + $0x40] sm:$0xff] }
   0xa   :  { %2706 = vmatmul.mubr.msk.bf16.vlgmr.msra.gmra.mrb[0].mxu1 %vm218_vm1, %v1037_v9  ;;  %v1040_v26 = vpack.c.bf16 %v3354_v25, %v3347_v24  ;;  %v1041_v29 = vpack.c.bf16 %v3368_v28, %v3361_v27 }
   0xb   :  { %1348 = vmatpush1.bf16.msra.mxu1 %v3088_v10  ;;  %1156 = vmatprep.mubr.bf16.mxu1 %v3185_v6 }
   0xc   :  { %1349 = vmatprep.subr.bf16.mxu1 %v3093_v11 }
   0xf   :  { %1350 = vmatpush1.bf16.msra.mxu1 %v3091_v14 }
  0x10   :  { %1351 = vmatprep.subr.bf16.mxu1 %v3096_v15 }
  0x12   :  { %2707 = vmatmul.mubr.msk.bf16.gmra.mrb[4].mxu1 %vm218_vm1, %v1038_v16 }
  0x13   :  { %1166 = vmatprep.mubr.bf16.mxu1 %v3185_v6  ;;  %1352 = vmatpush1.bf16.msra.mxu1 %v3094_v17 }
  0x14   :  { %1353 = vmatprep.subr.bf16.mxu1 %v3099_v18 }
  0x17   :  { %1354 = vmatpush1.bf16.msra.mxu1 %v3097_v21 }
  0x1a   :  { %2708 = vmatmul.mubr.msk.bf16.gmra.mrb[8].mxu1 %vm218_vm1, %v1039_v23 }
  0x1b   :  { %1176 = vmatprep.mubr.bf16.mxu1 %v3185_v6 }
  0x22   :  { %2709 = vmatmul.mubr.msk.bf16.gmra.mrb[12].mxu1 %vm218_vm1, %v1040_v26 }
  0x23   :  { %1186 = vmatprep.mubr.bf16.mxu1 %v3185_v6 }
  0x24   :  { %21 = vsyncpa [#allocation4], 0  ;;  %v3377_v30 = vld [vmem:[%s4514_s2 + $0x50] sm:$0xff]  ;;  %v3382_v31 = vld [vmem:[%s4514_s2 + $0x58] sm:$0xff]  ;;  %vm740_vm3 = vcmask 130048  }
  0x25   :  { %v1042_v32 = vpack.c.bf16 %v3382_v31, %v3377_v30  ;;  %v3391_v33 = vld [vmem:[%s4514_s2 + $0x60] sm:$0xff]  ;;  %v3396_v34 = vld [vmem:[%s4514_s2 + $0x68] sm:$0xff]  ;;  %v3405_v36 = vld [vmem:[%s4514_s2 + $0x70] sm:$0xff] }
  0x26   :  { %v1043_v35 = vpack.c.bf16 %v3396_v34, %v3391_v33  ;;  %v3410_v37 = vld [vmem:[%s4514_s2 + $0x78] sm:$0xff]  ;;  %v3419_v39 = vld [vmem:[%s4514_s2 + $0x80] sm:$0xff]  ;;  %v3424_v40 = vld [vmem:[%s4514_s2 + $0x88] sm:$0xff] }
  0x27   :  { %v1044_v38 = vpack.c.bf16 %v3410_v37, %v3405_v36  ;;  %v1045_v41 = vpack.c.bf16 %v3424_v40, %v3419_v39  ;;  %v3433_v42 = vld [vmem:[%s4514_s2 + $0x90] sm:$0xff]  ;;  %v3438_v43 = vld [vmem:[%s4514_s2 + $0x98] sm:$0xff]  ;;  %v3447_v45 = vld [vmem:[%s4514_s2 + $0xa0] sm:$0xff] }
  0x28   :  { %v1046_v44 = vpack.c.bf16 %v3438_v43, %v3433_v42  ;;  %v3452_v46 = vld [vmem:[%s4514_s2 + $0xa8] sm:$0xff]  ;;  %v3461_v48 = vld [vmem:[%s4514_s2 + $0xb0] sm:$0xff]  ;;  %v3466_v49 = vld [vmem:[%s4514_s2 + $0xb8] sm:$0xff] }
  0x29   :  { %v1047_v47 = vpack.c.bf16 %v3452_v46, %v3447_v45  ;;  %v1048_v50 = vpack.c.bf16 %v3466_v49, %v3461_v48  ;;  %v3475_v51 = vld [vmem:[%s4514_s2 + $0xc0] sm:$0xff]  ;;  %v3480_v52 = vld [vmem:[%s4514_s2 + $0xc8] sm:$0xff]  ;;  %v3489_v54 = vld [vmem:[%s4514_s2 + $0xd0] sm:$0xff] }
  0x2a   :  { %2710 = vmatmul.mubr.msk.bf16.gmra.mrb[16].mxu1 %vm218_vm1, %v1041_v29  ;;  %v1049_v53 = vpack.c.bf16 %v3480_v52, %v3475_v51  ;;  %v3494_v55 = vld [vmem:[%s4514_s2 + $0xd8] sm:$0xff]  ;;  %v3503_v57 = vld [vmem:[%s4514_s2 + $0xe0] sm:$0xff]  ;;  %v3508_v58 = vld [vmem:[%s4514_s2 + $0xe8] sm:$0xff] }
  0x2b   :  { %1196 = vmatprep.mubr.bf16.mxu1 %v3185_v6  ;;  %v1050_v56 = vpack.c.bf16 %v3494_v55, %v3489_v54  ;;  %v1051_v59 = vpack.c.bf16 %v3508_v58, %v3503_v57  ;;  %v3515_v60 = vld [vmem:[%s4516_s4] ss:$0 sm:$0xff]  ;;  %v3524_v62 = vld [vmem:[%s4514_s2 + $0xf0] sm:$0xff]  ;;  %v3529_v63 = vld [vmem:[%s4514_s2 + $0xf8] sm:$0xff] }
  0x2c   :  { %v186_v61 = vmul.f32 %v3515_v60, %v3273_v2  ;;  %v1052_v1 = vpack.c.bf16 %v3529_v63, %v3524_v62  ;;  %v187_v2 = vmul.f32 %v3515_v60, %v3278_v3  ;;  %v188_v5 = vmul.f32 %v3515_v60, %v3299_v12  ;;  %v3116_v9 = vld [vmem:[%s4515_s3] sm:$0xff]   ;;  %v3117_v10 = vld [vmem:[%s4515_s3 + $0x8] sm:$0xff]   ;;  %v3118_v17 = vld [vmem:[%s4515_s3 + $0x10] sm:$0xff]  }
  0x2d   :  { %v189_v7 = vmul.f32 %v3515_v60, %v3304_v13  ;;  %v190_v8 = vmul.f32 %v3515_v60, %v3324_v19  ;;  %v192_v3 = vmul.f32 %v3515_v60, %v3347_v24  ;;  %2928 = vmatprep.subr.bf16.mxu0 %v3116_v9  ;;  %v191_v14 = vmul.f32 %v3515_v60, %v3330_v20  ;;  %v3576_v23 = vld [vmem:[%s4513_s1 + $0x8] sm:$0xff]   ;;  %v3119_v24 = vld [vmem:[%s4515_s3 + $0x18] sm:$0xff]  }
  0x2e   :  { %v219_v0 = vsel %vm218_vm1, %v186_v61, 0.0  ;;  %v222_v4 = vsel %vm218_vm1, %v187_v2, 0.0  ;;  %v225_v11 = vsel %vm218_vm1, %v188_v5, 0.0  ;;  %2929 = vmatpush3.bf16.msra.mxu0 %v3116_v9  ;;  %v194_v16 = vmul.f32 %v3515_v60, %v3361_v27  ;;  %v3125_v2 = vld [vmem:[%s4521_s9 + $0x10] sm:$0xff]   ;;  %v3667_v9 = vld [vmem:[%s4513_s1 + $0x28] sm:$0xff]  }
  0x2f   :  { %220 = vadd.xlane.f32.xlu0 %v219_v0  ;;  %v231_v12 = vsel %vm218_vm1, %v190_v8, 0.0  ;;  %226 = vadd.xlane.f32.xlu1 %v225_v11  ;;  %v228_v13 = vsel %vm218_vm1, %v189_v7, 0.0  ;;  %v237_v15 = vsel %vm218_vm1, %v192_v3, 0.0  ;;  %v234_v18 = vsel %vm218_vm1, %v191_v14, 0.0  ;;  %v3127_v8 = vld [vmem:[%s4521_s9 + $0x18] sm:$0xff]   ;;  %v3675_v3 = vld [vmem:[%s4513_s1 + $0x30] sm:$0xff]  }
  0x30   :  { %2930 = vmatprep.subr.bf16.mxu0 %v3117_v10  ;;  %v193_v19 = vmul.f32 %v3515_v60, %v3354_v25  ;;  %v243_v20 = vsel %vm218_vm1, %v194_v16, 0.0  ;;  %v196_v21 = vmul.f32 %v3515_v60, %v3377_v30  ;;  %v195_v26 = vmul.f32 %v3515_v60, %v3368_v28  ;;  %v3120_v30 = vld [vmem:[%s4521_s9 + $0x40] sm:$0xff]   ;;  %v3595_v28 = vld [vmem:[%s4513_s1 + $0x10] sm:$0xff]   ;;  %v3130_v14 = vld [vmem:[%s4521_s9 + $0x68] sm:$0xff]  }
  0x31   :  { %v198_v29 = vmul.f32 %v3515_v60, %v3391_v33  ;;  %v3121_v33 = vld [vmem:[%s4521_s9] sm:$0xff]   ;;  %v201_v61 = vmul.f32 %v3515_v60, %v3410_v37  ;;  %v203_v5 = vmul.f32 %v3515_v60, %v3424_v40  ;;  %v206_v7 = vmul.f32 %v3515_v60, %v3447_v45 }
  0x32   :  { %2711 = vmatmul.mubr.msk.bf16.gmra.mrb[20].mxu1 %vm218_vm1, %v1042_v32  ;;  %2931 = vmatpush3.bf16.msra.mxu0 %v3117_v10  ;;  %v240_v25 = vsel %vm218_vm1, %v193_v19, 0.0  ;;  %v249_v27 = vsel %vm218_vm1, %v196_v21, 0.0  ;;  %v246_v32 = vsel %vm218_vm1, %v195_v26, 0.0  ;;  %v3128_v40 = vld [vmem:[%s4521_s9 + $0x60] sm:$0xff]   ;;  %v205_v10 = vmul.f32 %v3515_v60, %v3438_v43 }
  0x33   :  { %1206 = vmatprep.mubr.bf16.mxu1 %v3185_v6  ;;  %223 = vadd.xlane.f32.xlu0 %v222_v4  ;;  %v3126_v4 = vld [vmem:[%s4521_s9 + $0x58] sm:$0xff]   ;;  %v264_v37 = vsel %vm218_vm1, %v201_v61, 0.0  ;;  %v270_v45 = vsel %vm218_vm1, %v203_v5, 0.0  ;;  %v279_v11 = vsel %vm218_vm1, %v206_v7, 0.0  ;;  %v210_v16 = vmul.f32 %v3515_v60, %v3475_v51  ;;  %v3716_v19 = vld [vmem:[%s4513_s1 + $0x40] sm:$0xff]  }
  0x34   :  { %229 = vadd.xlane.f32.xlu1 %v228_v13  ;;  %2932 = vmatprep.subr.bf16.mxu0 %v3118_v17  ;;  %v3129_v13 = vld [vmem:[%s4521_s9 + $0x20] sm:$0xff]   ;;  %v276_v43 = vsel %vm218_vm1, %v205_v10, 0.0  ;;  %v211_v26 = vmul.f32 %v3515_v60, %v3480_v52 }
  0x35   :  { %v291_v21 = vsel %vm218_vm1, %v210_v16, 0.0  ;;  %v117_v16 = vunpack.c.l.bf16 %v3576_v23 }
  0x36   :  { %2933 = vmatpush3.bf16.msra.mxu0 %v3118_v17  ;;  %v3131_v17 = vld [vmem:[%s4521_s9 + $0x28] sm:$0xff]   ;;  %v294_v52 = vsel %vm218_vm1, %v211_v26, 0.0 }
  0x37   :  { %232 = vadd.xlane.f32.xlu0 %v231_v12  ;;  %2934 = vmatprep.subr.bf16.mxu0 %v3119_v24  ;;  %v208_v12 = vmul.f32 %v3515_v60, %v3461_v48 }
  0x38   :  { %235 = vadd.xlane.f32.xlu1 %v234_v18  ;;  %v3708_v18 = vld [vmem:[%s4513_s1 + $0x38] sm:$0xff]  }
  0x39   :  { %v285_v48 = vsel %vm218_vm1, %v208_v12, 0.0  ;;  %v115_v12 = vunpack.c.l.bf16 %v3338_v22 }
  0x3a   :  { %2712 = vmatmul.mubr.msk.bf16.gmra.mrb[24].mxu1 %vm218_vm1, %v1043_v35  ;;  %v197_v35 = vmul.f32 %v3515_v60, %v3382_v31  ;;  %2935 = vmatpush3.bf16.msra.mxu0 %v3119_v24  ;;  %v212_v24 = vmul.f32 %v3515_v60, %v3489_v54 }
  0x3b   :  { %1216 = vmatprep.mubr.bf16.mxu1 %v3185_v6  ;;  %238 = vadd.xlane.f32.xlu0 %v237_v15  ;;  %v207_v15 = vmul.f32 %v3515_v60, %v3452_v46  ;;  %v3132_v46 = vld [vmem:[%s4521_s9 + $0x70] sm:$0xff]  }
  0x3c   :  { %241 = vadd.xlane.f32.xlu1 %v240_v25  ;;  %2792 = vmatprep.subr.bf16.mxu0 %v3120_v30  ;;  %v252_v31 = vsel %vm218_vm1, %v197_v35, 0.0  ;;  %v3133_v25 = vld [vmem:[%s4521_s9 + $0x30] sm:$0xff]   ;;  %v297_v54 = vsel %vm218_vm1, %v212_v24, 0.0  ;;  %v216_v35 = vmul.f32 %v3515_v60, %v3524_v62  ;;  %v3775_v62 = vld [vmem:[%s4513_s1 + $0x60] sm:$0xff]  }
  0x3d   :  { %2937 = vmatmul.mubr.msk.bf16.vlgmr.msra.gmra.mrb[0].mxu0 %vm498_vm2, %v3576_v23  ;;  %v282_v51 = vsel %vm218_vm1, %v207_v15, 0.0  ;;  %v3748_v30 = vld [vmem:[%s4513_s1 + $0x50] sm:$0xff]  }
  0x3e   :  { %2793 = vmatpush3.bf16.msra.mxu0 %v3121_v33  ;;  %2940 = vmatprep.mubr.msk.bf16.mxu0 %vm498_vm2, %v3595_v28 }
  0x3f   :  { %244 = vadd.xlane.f32.xlu0 %v243_v20  ;;  %v209_v20 = vmul.f32 %v3515_v60, %v3466_v49 }
  0x40   :  { %247 = vadd.xlane.f32.xlu1 %v246_v32 }
  0x41   :  { %v288_v49 = vsel %vm218_vm1, %v209_v20, 0.0  ;;  %v119_v20 = vunpack.c.l.bf16 %v3595_v28 }
  0x42   :  { %2713 = vmatmul.mubr.msk.bf16.gmra.mrb[28].mxu1 %vm218_vm1, %v1044_v38  ;;  %v255_v38 = vsel %vm218_vm1, %v198_v29, 0.0  ;;  %v3743_v29 = vld [vmem:[%s4513_s1 + $0x48] sm:$0xff]  }
  0x43   :  { %1226 = vmatprep.mubr.bf16.mxu1 %v3185_v6  ;;  %250 = vadd.xlane.f32.xlu0 %v249_v27  ;;  %v214_v27 = vmul.f32 %v3515_v60, %v3503_v57  ;;  %v213_v57 = vmul.f32 %v3515_v60, %v3494_v55  ;;  %v309_v55 = vsel %vm218_vm1, %v216_v35, 0.0 }
  0x44   :  { %253 = vadd.xlane.f32.xlu1 %v252_v31  ;;  %v116_v31 = vunpack.c.h.bf16 %v3338_v22 }
  0x45   :  { %v303_v32 = vsel %vm218_vm1, %v214_v27, 0.0  ;;  %v300_v33 = vsel %vm218_vm1, %v213_v57, 0.0 }
  0x47   :  { %256 = vadd.xlane.f32.xlu0 %v255_v38  ;;  %v215_v38 = vmul.f32 %v3515_v60, %v3508_v58 }
  0x49   :  { %v306_v58 = vsel %vm218_vm1, %v215_v38, 0.0 }
  0x4a   :  { %2714 = vmatmul.mubr.msk.bf16.gmra.mrb[32].mxu1 %vm218_vm1, %v1045_v41  ;;  %v200_v41 = vmul.f32 %v3515_v60, %v3405_v36 }
  0x4b   :  { %1236 = vmatprep.mubr.bf16.mxu1 %v3185_v6 }
  0x4c   :  { %v261_v36 = vsel %vm218_vm1, %v200_v41, 0.0  ;;  %v3770_v41 = vld [vmem:[%s4513_s1 + $0x58] sm:$0xff]  }
  0x4d   :  { %262 = vadd.xlane.f32.xlu0 %v261_v36  ;;  %v838_v36 = vmul.f32 %v116_v31, %v116_v31  ;;  %v138_v31 = vunpack.c.h.bf16 %v3770_v41 }
  0x52   :  { %2715 = vmatmul.mubr.msk.bf16.gmra.mrb[36].mxu1 %vm218_vm1, %v1046_v44  ;;  %v3122_v44 = vld [vmem:[%s4521_s9 + $0x48] sm:$0xff]  }
  0x53   :  { %1246 = vmatprep.mubr.bf16.mxu1 %v3185_v6  ;;  %2794 = vmatprep.subr.bf16.mxu0 %v3122_v44  ;;  %v217_v44 = vmul.f32 %v3515_v60, %v3529_v63  ;;  %v3798_v63 = vld [vmem:[%s4513_s1 + $0x70] sm:$0xff]  }
  0x5a   :  { %2716 = vmatmul.mubr.msk.bf16.gmra.mrb[40].mxu1 %vm218_vm1, %v1047_v47  ;;  %v199_v47 = vmul.f32 %v3515_v60, %v3396_v34  ;;  %v3124_v34 = vld [vmem:[%s4521_s9 + $0x50] sm:$0xff]  }
  0x5b   :  { %1256 = vmatprep.mubr.bf16.mxu1 %v3185_v6 }
  0x62   :  { %2717 = vmatmul.mubr.msk.bf16.gmra.mrb[44].mxu1 %vm218_vm1, %v1048_v50  ;;  %v202_v50 = vmul.f32 %v3515_v60, %v3419_v39  ;;  %v258_v39 = vsel %vm218_vm1, %v199_v47, 0.0  ;;  %v312_v47 = vsel %vm218_vm1, %v217_v44, 0.0 }
  0x63   :  { %1266 = vmatprep.mubr.bf16.mxu1 %v3185_v6  ;;  %259 = vadd.xlane.f32.xlu1 %v258_v39  ;;  %v120_v39 = vunpack.c.h.bf16 %v3595_v28 }
  0x64   :  { %v267_v0 = vsel %vm218_vm1, %v202_v50, 0.0  ;;  %v118_v50 = vunpack.c.h.bf16 %v3576_v23 }
  0x65   :  { %268 = vadd.xlane.f32.xlu0 %v267_v0  ;;  %v842_v0 = vmul.f32 %v120_v39, %v120_v39  ;;  %v127_v39 = vunpack.c.l.bf16 %v3675_v3 }
  0x67   :  { %265 = vadd.xlane.f32.xlu1 %v264_v37 }
  0x6a   :  { %2718 = vmatmul.mubr.msk.bf16.gmra.mrb[48].mxu1 %vm218_vm1, %v1049_v53  ;;  %v3123_v53 = vld [vmem:[%s4521_s9 + $0x8] sm:$0xff]  }
  0x6b   :  { %1276 = vmatprep.mubr.bf16.mxu1 %v3185_v6  ;;  %2795 = vmatpush3.bf16.msra.mxu0 %v3123_v53  ;;  %v872_v53 = vsel %vm498_vm2, %v838_v36, 0.0 }
  0x6c   :  { %2796 = vmatprep.subr.bf16.mxu0 %v3124_v34  ;;  %271 = vadd.xlane.f32.xlu1 %v270_v45  ;;  %v840_v34 = vmul.f32 %v118_v50, %v118_v50 }
  0x6e   :  { %v878_v61 = vsel %vm498_vm2, %v840_v34, 0.0  ;;  %v140_v34 = vunpack.c.h.bf16 %v3775_v62 }
  0x6f   :  { %2797 = vmatpush3.bf16.msra.mxu0 %v3125_v2  ;;  %v3814_v2 = vld [vmem:[%s4513_s1 + $0x78] sm:$0xff]  }
  0x70   :  { %2798 = vmatprep.subr.bf16.mxu0 %v3126_v4  ;;  %277 = vadd.xlane.f32.xlu1 %v276_v43  ;;  %v884_v4 = vsel %vm498_vm2, %v842_v0, 0.0 }
  0x72   :  { %2719 = vmatmul.mubr.msk.bf16.gmra.mrb[52].mxu1 %vm218_vm1, %v1050_v56  ;;  %v3626_v56 = vld [vmem:[%s4513_s1 + $0x18] sm:$0xff]  }
  0x73   :  { %1286 = vmatprep.mubr.bf16.mxu1 %v3185_v6  ;;  %2941 = vmatmul.mubr.msk.bf16.gmra.mrb[4].mxu0 %vm498_vm2, %v3626_v56  ;;  %v121_v27 = vunpack.c.l.bf16 %v3626_v56 }
  0x74   :  { %2799 = vmatpush3.bf16.msra.mxu0 %v3127_v8  ;;  %283 = vadd.xlane.f32.xlu1 %v282_v51  ;;  %v126_v8 = vunpack.c.h.bf16 %v3667_v9  ;;  %v132_v51 = vunpack.c.h.bf16 %v3716_v19 }
  0x75   :  { %2800 = vmatprep.subr.bf16.mxu0 %v3128_v40  ;;  %v843_v57 = vmul.f32 %v121_v27, %v121_v27 }
  0x76   :  { %v848_v45 = vmul.f32 %v126_v8, %v126_v8  ;;  %v144_v8 = vunpack.c.h.bf16 %v3798_v63 }
  0x77   :  { %v887_v35 = vsel %vm498_vm2, %v843_v57, 0.0 }
  0x78   :  { %2801 = vmatpush3.bf16.msra.mxu0 %v3129_v13  ;;  %289 = vadd.xlane.f32.xlu1 %v288_v49  ;;  %v902_v10 = vsel %vm498_vm2, %v848_v45, 0.0  ;;  %v841_v49 = vmul.f32 %v119_v20, %v119_v20 }
  0x79   :  { %2802 = vmatprep.subr.bf16.mxu0 %v3130_v14  ;;  %v837_v14 = vmul.f32 %v115_v12, %v115_v12  ;;  %v146_v12 = vunpack.c.h.bf16 %v3814_v2 }
  0x7a   :  { %2720 = vmatmul.mubr.msk.bf16.gmra.mrb[56].mxu1 %vm218_vm1, %v1051_v59  ;;  %v3634_v59 = vld [vmem:[%s4513_s1 + $0x20] sm:$0xff]   ;;  %v881_v26 = vsel %vm498_vm2, %v841_v49, 0.0 }
  0x7b   :  { %1296 = vmatprep.mubr.bf16.mxu1 %v3185_v6  ;;  %2944 = vmatprep.mubr.msk.bf16.mxu0 %vm498_vm2, %v3634_v59  ;;  %v124_v5 = vunpack.c.h.bf16 %v3634_v59  ;;  %v869_v15 = vsel %vm498_vm2, %v837_v14, 0.0  ;;  %v123_v38 = vunpack.c.l.bf16 %v3634_v59 }
  0x7c   :  { %2945 = vmatmul.mubr.msk.bf16.gmra.mrb[8].mxu0 %vm498_vm2, %v3667_v9  ;;  %295 = vadd.xlane.f32.xlu1 %v294_v52 }
  0x7d   :  { %2948 = vmatprep.mubr.msk.bf16.mxu0 %vm498_vm2, %v3675_v3  ;;  %2803 = vmatpush3.bf16.msra.mxu0 %v3131_v17  ;;  %v846_v7 = vmul.f32 %v124_v5, %v124_v5 }
  0x7e   :  { %2804 = vmatprep.subr.bf16.mxu0 %v3132_v46  ;;  %v839_v46 = vmul.f32 %v117_v16, %v117_v16 }
  0x7f   :  { %v896_v40 = vsel %vm498_vm2, %v846_v7, 0.0 }
  0x80   :  { %301 = vadd.xlane.f32.xlu1 %v300_v33  ;;  %v875_v24 = vsel %vm498_vm2, %v839_v46, 0.0  ;;  %v136_v33 = vunpack.c.h.bf16 %v3748_v30 }
  0x81   :  { %2805 = vmatpush3.bf16.msra.mxu0 %v3133_v25  ;;  %v854_v25 = vmul.f32 %v132_v51, %v132_v51 }
  0x82   :  { %2721 = vmatmul.mubr.msk.bf16.gmra.mrb[60].mxu1 %vm218_vm1, %v1052_v1  ;;  %v204_v1 = vmul.f32 %v3515_v60, %v3433_v42  ;;  %v3793_v60 = vld [vmem:[%s4513_s1 + $0x68] sm:$0xff]  }
  0x83   :  { %1379 = vmatprep.mubr.bf16.mxu1 %v3185_v6 }
  0x84   :  { %v273_v42 = vsel %vm218_vm1, %v204_v1, 0.0  ;;  %2949 = vmatmul.mubr.msk.bf16.gmra.mrb[12].mxu0 %vm498_vm2, %v3708_v18  ;;  %307 = vadd.xlane.f32.xlu1 %v306_v58  ;;  %v122_v1 = vunpack.c.h.bf16 %v3626_v56 }
  0x85   :  { %274 = vadd.xlane.f32.xlu0 %v273_v42  ;;  %2952 = vmatprep.mubr.msk.bf16.mxu0 %vm498_vm2, %v3716_v19 }
  0x86   :  { %v844_v37 = vmul.f32 %v122_v1, %v122_v1 }
  0x88   :  { %313 = vadd.xlane.f32.xlu1 %v312_v47  ;;  %v890_v42 = vsel %vm498_vm2, %v844_v37, 0.0  ;;  %v125_v47 = vunpack.c.l.bf16 %v3667_v9  ;;  %v129_v37 = vunpack.c.l.bf16 %v3708_v18 }
  0x89   :  { %280 = vadd.xlane.f32.xlu0 %v279_v11  ;;  %v128_v11 = vunpack.c.h.bf16 %v3675_v3 }
  0x8a   :  { %2730 = vmatmul.mubr.msk.bf16.vlgmr.msra.gmra.mrb[0].mxu1 %vm498_vm2, %v3338_v22  ;;  %v847_v36 = vmul.f32 %v125_v47, %v125_v47  ;;  %v851_v5 = vmul.f32 %v129_v37, %v129_v37 }
  0x8b   :  { %1389 = vmatprep.mubr.bf16.mxu1 %v3185_v6  ;;  %v850_v13 = vmul.f32 %v128_v11, %v128_v11 }
  0x8c   :  { %2953 = vmatmul.mubr.msk.bf16.gmra.mrb[16].mxu0 %vm498_vm2, %v3743_v29  ;;  %873 = vadd.xlane.f32.xlu1 %v872_v53  ;;  %v899_v53 = vsel %vm498_vm2, %v847_v36, 0.0  ;;  %v911_v7 = vsel %vm498_vm2, %v851_v5, 0.0 }
  0x8d   :  { %286 = vadd.xlane.f32.xlu0 %v285_v48  ;;  %2956 = vmatprep.mubr.msk.bf16.mxu0 %vm498_vm2, %v3748_v30  ;;  %v908_v43 = vsel %vm498_vm2, %v850_v13, 0.0  ;;  %v130_v48 = vunpack.c.h.bf16 %v3708_v18  ;;  %v133_v13 = vunpack.c.l.bf16 %v3743_v29 }
  0x8f   :  { %v852_v17 = vmul.f32 %v130_v48, %v130_v48  ;;  %v855_v14 = vmul.f32 %v133_v13, %v133_v13 }
  0x90   :  { %879 = vadd.xlane.f32.xlu1 %v878_v61  ;;  %v849_v61 = vmul.f32 %v127_v39, %v127_v39 }
  0x91   :  { %292 = vadd.xlane.f32.xlu0 %v291_v21  ;;  %v914_v22 = vsel %vm498_vm2, %v852_v17, 0.0  ;;  %v3134_v21 = vld [vmem:[%s4521_s9 + $0x78] sm:$0xff]  }
  0x92   :  { %2731 = vmatmul.mubr.msk.bf16.gmra.mrb[4].mxu1 %vm498_vm2, %v3576_v23  ;;  %v3135_v23 = vld [vmem:[%s4521_s9 + $0x38] sm:$0xff]   ;;  %2806 = vmatprep.subr.bf16.mxu0 %v3134_v21  ;;  %v905_v1 = vsel %vm498_vm2, %v849_v61, 0.0  ;;  %v141_v21 = vunpack.c.l.bf16 %v3793_v60 }
  0x93   :  { %1399 = vmatprep.mubr.bf16.mxu1 %v3185_v6  ;;  %2807 = vmatpush3.bf16.msra.mxu0 %v3135_v23  ;;  %v148_v23 = vld [vmem:[%s4512_s0 + $0x8] sm:$0xff] }
  0x94   :  { %2957 = vmatmul.mubr.msk.bf16.gmra.mrb[20].mxu0 %vm498_vm2, %v3770_v41  ;;  %885 = vadd.xlane.f32.xlu1 %v884_v4  ;;  %v142_v4 = vunpack.c.h.bf16 %v3793_v60  ;;  %v863_v49 = vmul.f32 %v141_v21, %v141_v21  ;;  %v160_v21 = vld [vmem:[%s4512_s0 + $0x68] sm:$0xff] }
  0x95   :  { %298 = vadd.xlane.f32.xlu0 %v297_v54  ;;  %2960 = vmatprep.mubr.msk.bf16.mxu0 %vm498_vm2, %v3775_v62  ;;  %v134_v54 = vunpack.c.h.bf16 %v3743_v29 }
  0x97   :  { %v856_v52 = vmul.f32 %v134_v54, %v134_v54 }
  0x98   :  { %891 = vadd.xlane.f32.xlu1 %v890_v42 }
  0x99   :  { %304 = vadd.xlane.f32.xlu0 %v303_v32  ;;  %v926_v32 = vsel %vm498_vm2, %v856_v52, 0.0 }
  0x9a   :  { %2732 = vmatmul.mubr.msk.bf16.gmra.mrb[8].mxu1 %vm498_vm2, %v3595_v28  ;;  %v920_v28 = vsel %vm498_vm2, %v854_v25, 0.0 }
  0x9b   :  { %1409 = vmatprep.mubr.bf16.mxu1 %v3185_v6 }
  0x9c   :  { %2961 = vmatmul.mubr.msk.bf16.gmra.mrb[24].mxu0 %vm498_vm2, %v3793_v60  ;;  %897 = vadd.xlane.f32.xlu1 %v896_v40  ;;  %v131_v40 = vunpack.c.l.bf16 %v3716_v19 }
  0x9d   :  { %310 = vadd.xlane.f32.xlu0 %v309_v55  ;;  %2964 = vmatprep.mubr.msk.bf16.mxu0 %vm498_vm2, %v3798_v63  ;;  %v845_v55 = vmul.f32 %v123_v38, %v123_v38 }
  0x9e   :  { %v853_v45 = vmul.f32 %v131_v40, %v131_v40 }
  0x9f   :  { %v893_v44 = vsel %vm498_vm2, %v845_v55, 0.0 }
  0xa0   :  { %903 = vadd.xlane.f32.xlu1 %v902_v10  ;;  %v917_v11 = vsel %vm498_vm2, %v853_v45, 0.0  ;;  %v157_v45 = vld [vmem:[%s4512_s0 + $0x50] sm:$0xff] }
  0xa1   :  { %870 = vadd.xlane.f32.xlu0 %v869_v15  ;;  %v923_v15 = vsel %vm498_vm2, %v855_v14, 0.0 }
  0xa2   :  { %2733 = vmatmul.mubr.msk.bf16.gmra.mrb[12].mxu1 %vm498_vm2, %v3626_v56  ;;  %v858_v56 = vmul.f32 %v136_v33, %v136_v33  ;;  %v150_v33 = vld [vmem:[%s4512_s0 + $0x18] sm:$0xff] }
  0xa3   :  { %1419 = vmatprep.mubr.bf16.mxu1 %v3185_v6 }
  0xa4   :  { %2965 = vmatmul.mubr.msk.bf16.gmra.mrb[28].mxu0 %vm498_vm2, %v3814_v2  ;;  %909 = vadd.xlane.f32.xlu1 %v908_v43  ;;  %v932_v58 = vsel %vm498_vm2, %v858_v56, 0.0 }
  0xa5   :  { %876 = vadd.xlane.f32.xlu0 %v875_v24  ;;  %v3900_v24 = vld [vmem:[#allocation2] ss:$0 sm:$0xff] }
  0xa8   :  { %915 = vadd.xlane.f32.xlu1 %v914_v22  ;;  %v139_v22 = vunpack.c.l.bf16 %v3775_v62 }
  0xa9   :  { %882 = vadd.xlane.f32.xlu0 %v881_v26  ;;  %v143_v26 = vunpack.c.l.bf16 %v3798_v63 }
  0xaa   :  { %2734 = vmatmul.mubr.msk.bf16.gmra.mrb[16].mxu1 %vm498_vm2, %v3634_v59  ;;  %v860_v59 = vmul.f32 %v138_v31, %v138_v31  ;;  %v861_v20 = vmul.f32 %v139_v22, %v139_v22 }
  0xab   :  { %1429 = vmatprep.mubr.bf16.mxu1 %v3185_v6  ;;  %v865_v52 = vmul.f32 %v143_v26, %v143_v26 }
  0xac   :  { %921 = vadd.xlane.f32.xlu1 %v920_v28  ;;  %v938_v50 = vsel %vm498_vm2, %v860_v59, 0.0  ;;  %v152_v59 = vld [vmem:[%s4512_s0 + $0x28] sm:$0xff] }
  0xad   :  { %888 = vadd.xlane.f32.xlu0 %v887_v35  ;;  %v145_v35 = vunpack.c.l.bf16 %v3814_v2 }
  0xaf   :  { %v867_v56 = vmul.f32 %v145_v35, %v145_v35 }
  0xb0   :  { %927 = vadd.xlane.f32.xlu1 %v926_v32  ;;  %v953_v32 = vsel %vm498_vm2, %v865_v52, 0.0 }
  0xb1   :  { %894 = vadd.xlane.f32.xlu0 %v893_v44  ;;  %v151_v44 = vld [vmem:[%s4512_s0 + $0x20] sm:$0xff] }
  0xb2   :  { %2735 = vmatmul.mubr.msk.bf16.gmra.mrb[20].mxu1 %vm498_vm2, %v3667_v9  ;;  %v862_v9 = vmul.f32 %v140_v34, %v140_v34  ;;  %v153_v34 = vld [vmem:[%s4512_s0 + $0x30] sm:$0xff] }
  0xb3   :  { %1439 = vmatprep.mubr.bf16.mxu1 %v3185_v6 }
  0xb4   :  { %933 = vadd.xlane.f32.xlu1 %v932_v58  ;;  %v944_v0 = vsel %vm498_vm2, %v862_v9, 0.0  ;;  %v959_v58 = vsel %vm498_vm2, %v867_v56, 0.0 }
  0xb5   :  { %900 = vadd.xlane.f32.xlu0 %v899_v53 }
  0xb8   :  { %939 = vadd.xlane.f32.xlu1 %v938_v50 }
  0xb9   :  { %906 = vadd.xlane.f32.xlu0 %v905_v1  ;;  %v154_v1 = vld [vmem:[%s4512_s0 + $0x38] sm:$0xff] }
  0xba   :  { %2736 = vmatmul.mubr.msk.bf16.gmra.mrb[24].mxu1 %vm498_vm2, %v3675_v3  ;;  %v864_v3 = vmul.f32 %v142_v4, %v142_v4 }
  0xbb   :  { %1449 = vmatprep.mubr.bf16.mxu1 %v3185_v6 }
  0xbc   :  { %945 = vadd.xlane.f32.xlu1 %v944_v0  ;;  %v950_v42 = vsel %vm498_vm2, %v864_v3, 0.0  ;;  %v221_v51 = vpop.xlane.xlu0 %220  ;;  %v227_v54 = vpop.xlane.xlu1 %226  ;;  %v147_v0 = vld [vmem:[%s4512_s0] sm:$0xff] }
  0xbd   :  { %912 = vadd.xlane.f32.xlu0 %v911_v7  ;;  %v315_v3 = vadd.f32 %v221_v51, %v147_v0  ;;  %v161_v51 = vld [vmem:[%s4512_s0 + $0x70] sm:$0xff] }
  0xbf   :  { %v354_v40 = vadd.f32 %v3900_v24, %v315_v3  ;;  %v171_v3 = vld [vmem:[%s4512_s0 + $0xc0] sm:$0xff] }
  0xc0   :  { %951 = vadd.xlane.f32.xlu1 %v950_v42  ;;  %v155_v42 = vld [vmem:[%s4512_s0 + $0x40] sm:$0xff] }
  0xc1   :  { %918 = vadd.xlane.f32.xlu0 %v917_v11 }
  0xc2   :  { %2737 = vmatmul.mubr.msk.bf16.gmra.mrb[28].mxu1 %vm498_vm2, %v3708_v18  ;;  %v866_v18 = vmul.f32 %v144_v8, %v144_v8 }
  0xc3   :  { %1459 = vmatprep.mubr.bf16.mxu1 %v3185_v6 }
  0xc4   :  { %v956_v10 = vsel %vm498_vm2, %v866_v18, 0.0 }
  0xc5   :  { %957 = vadd.xlane.f32.xlu1 %v956_v10  ;;  %924 = vadd.xlane.f32.xlu0 %v923_v15  ;;  %v159_v15 = vld [vmem:[%s4512_s0 + $0x60] sm:$0xff] }
  0xca   :  { %2738 = vmatmul.mubr.msk.bf16.gmra.mrb[32].mxu1 %vm498_vm2, %v3716_v19  ;;  %v868_v19 = vmul.f32 %v146_v12, %v146_v12  ;;  %v156_v12 = vld [vmem:[%s4512_s0 + $0x48] sm:$0xff] }
  0xcb   :  { %1469 = vmatprep.mubr.bf16.mxu1 %v3185_v6 }
  0xcc   :  { %v962_v43 = vsel %vm498_vm2, %v868_v19, 0.0 }
  0xcd   :  { %963 = vadd.xlane.f32.xlu1 %v962_v43 }
  0xd2   :  { %2739 = vmatmul.mubr.msk.bf16.gmra.mrb[36].mxu1 %vm498_vm2, %v3743_v29  ;;  %v137_v29 = vunpack.c.l.bf16 %v3770_v41 }
  0xd3   :  { %1479 = vmatprep.mubr.bf16.mxu1 %v3185_v6 }
  0xd4   :  { %v859_v17 = vmul.f32 %v137_v29, %v137_v29 }
  0xd6   :  { %v935_v46 = vsel %vm498_vm2, %v859_v17, 0.0 }
  0xda   :  { %2740 = vmatmul.mubr.msk.bf16.gmra.mrb[40].mxu1 %vm498_vm2, %v3748_v30 }
  0xdb   :  { %1489 = vmatprep.mubr.bf16.mxu1 %v3185_v6 }
  0xe2   :  { %2741 = vmatmul.mubr.msk.bf16.gmra.mrb[44].mxu1 %vm498_vm2, %v3770_v41  ;;  %v224_v41 = vpop.xlane.xlu0 %223 }
  0xe3   :  { %1499 = vmatprep.mubr.bf16.mxu1 %v3185_v6  ;;  %v316_v25 = vadd.f32 %v224_v41, %v148_v23 }
  0xe5   :  { %v355_v28 = vadd.f32 %v3900_v24, %v316_v25 }
  0xe6   :  { %v233_v31 = vpop.xlane.xlu0 %232 }
  0xe7   :  { %2080 = vperm.xlu1 %3085, %v355_v28   ;;  %v163_v28 = vld [vmem:[%s4512_s0 + $0x80] sm:$0xff] }
  0xea   :  { %2742 = vmatmul.mubr.msk.bf16.gmra.mrb[48].mxu1 %vm498_vm2, %v3775_v62  ;;  %v947_v62 = vsel %vm498_vm2, %v863_v49, 0.0  ;;  %v239_v39 = vpop.xlane.xlu0 %238 }
  0xeb   :  { %1509 = vmatprep.mubr.bf16.mxu1 %v3185_v6  ;;  %v321_v9 = vadd.f32 %v239_v39, %v153_v34  ;;  %v169_v34 = vld [vmem:[%s4512_s0 + $0xb0] sm:$0xff] }
  0xed   :  { %v360_v61 = vadd.f32 %v3900_v24, %v321_v9 }
  0xee   :  { %v245_v7 = vpop.xlane.xlu0 %244 }
  0xef   :  { %v323_v8 = vadd.f32 %v245_v7, %v155_v42  ;;  %v170_v7 = vld [vmem:[%s4512_s0 + $0xb8] sm:$0xff] }
  0xf1   :  { %v362_v18 = vadd.f32 %v3900_v24, %v323_v8 }
  0xf2   :  { %2743 = vmatmul.mubr.msk.bf16.gmra.mrb[52].mxu1 %vm498_vm2, %v3793_v60  ;;  %v149_v60 = vld [vmem:[%s4512_s0 + $0x10] sm:$0xff]  ;;  %v251_v10 = vpop.xlane.xlu0 %250 }
  0xf3   :  { %1519 = vmatprep.mubr.bf16.mxu1 %v3185_v6  ;;  %v317_v27 = vadd.f32 %v227_v54, %v149_v60  ;;  %v325_v11 = vadd.f32 %v251_v10, %v157_v45  ;;  %v162_v60 = vld [vmem:[%s4512_s0 + $0x78] sm:$0xff]  ;;  %v1542_v45 = vlaneseq }
  0xf5   :  { %v356_v57 = vadd.f32 %v3900_v24, %v317_v27  ;;  %v364_v14 = vadd.f32 %v3900_v24, %v325_v11  ;;  %v173_v11 = vld [vmem:[%s4512_s0 + $0xd0] sm:$0xff] }
  0xf7   :  { %2085 = vperm.xlu1 %3085, %v356_v57  }
  0xfa   :  { %2744 = vmatmul.mubr.msk.bf16.gmra.mrb[56].mxu1 %vm498_vm2, %v3798_v63  ;;  %v230_v63 = vpop.xlane.xlu1 %229 }
  0xfb   :  { %1529 = vmatprep.mubr.bf16.mxu1 %v3185_v6  ;;  %v135_v6 = vunpack.c.l.bf16 %v3748_v30  ;;  %v941_v30 = vsel %vm498_vm2, %v861_v20, 0.0  ;;  %v318_v38 = vadd.f32 %v230_v63, %v150_v33  ;;  %v164_v63 = vld [vmem:[%s4512_s0 + $0x88] sm:$0xff] }
  0xfd   :  { %v857_v48 = vmul.f32 %v135_v6, %v135_v6  ;;  %v357_v55 = vadd.f32 %v3900_v24, %v318_v38  ;;  %v257_v6 = vpop.xlane.xlu0 %256 }
  0xfe   :  { %v236_v36 = vpop.xlane.xlu1 %235 }
  0xff   :  { %v929_v16 = vsel %vm498_vm2, %v857_v48, 0.0  ;;  %2090 = vperm.xlu1 %3085, %v357_v55   ;;  %v320_v50 = vadd.f32 %v236_v36, %v152_v59  ;;  %v327_v48 = vadd.f32 %v257_v6, %v159_v15  ;;  %v4014_v6 = vshrl.u32 %v1542_v45, 7 }
 0x100   :  { %930 = vadd.xlane.f32.xlu0 %v929_v16  ;;  %v158_v16 = vld [vmem:[%s4512_s0 + $0x58] sm:$0xff] }
 0x101   :  { %v359_v53 = vadd.f32 %v3900_v24, %v320_v50  ;;  %v263_v20 = vpop.xlane.xlu0 %262 }
 0x102   :  { %2745 = vmatmul.mubr.msk.bf16.gmra.mrb[60].mxu1 %vm498_vm2, %v3814_v2  ;;  %v319_v2 = vadd.f32 %v233_v31, %v151_v44  ;;  %v242_v4 = vpop.xlane.xlu1 %241  ;;  %v167_v44 = vld [vmem:[%s4512_s0 + $0xa0] sm:$0xff] }
 0x103   :  { %v322_v37 = vadd.f32 %v242_v4, %v154_v1 }
 0x104   :  { %936 = vadd.xlane.f32.xlu0 %v935_v46  ;;  %v358_v47 = vadd.f32 %v3900_v24, %v319_v2  ;;  %v366_v46 = vadd.f32 %v3900_v24, %v327_v48 }
 0x105   :  { %v361_v5 = vadd.f32 %v3900_v24, %v322_v37 }
 0x106   :  { %2095 = vperm.xlu1 %3085, %v358_v47   ;;  %v248_v13 = vpop.xlane.xlu1 %247  ;;  %v166_v47 = vld [vmem:[%s4512_s0 + $0x98] sm:$0xff] }
 0x107   :  { %v324_v19 = vadd.f32 %v248_v13, %v156_v12 }
 0x108   :  { %942 = vadd.xlane.f32.xlu0 %v941_v30  ;;  %v329_v30 = vadd.f32 %v263_v20, %v161_v51 }
 0x109   :  { %v363_v43 = vadd.f32 %v3900_v24, %v324_v19  ;;  %v172_v19 = vld [vmem:[%s4512_s0 + $0xc8] sm:$0xff] }
 0x10a   :  { %2100 = vperm.xlu1 %3085, %v359_v53   ;;  %v254_v29 = vpop.xlane.xlu1 %253  ;;  %v368_v25 = vadd.f32 %v3900_v24, %v329_v30  ;;  %v4528_v30 = vsub.s32 0, %v4014_v6 }
 0x10b   :  { %v326_v17 = vadd.f32 %v254_v29, %v158_v16  ;;  %v175_v16 = vld [vmem:[%s4512_s0 + $0xe0] sm:$0xff] }
 0x10c   :  { %948 = vadd.xlane.f32.xlu0 %v947_v62  ;;  %v269_v62 = vpop.xlane.xlu0 %268 }
 0x10d   :  { %v365_v22 = vadd.f32 %v3900_v24, %v326_v17  ;;  %v331_v26 = vadd.f32 %v269_v62, %v163_v28 }
 0x10e   :  { %2105 = vperm.xlu1 %3085, %v360_v61   ;;  %v260_v23 = vpop.xlane.xlu1 %259  ;;  %v168_v61 = vld [vmem:[%s4512_s0 + $0xa8] sm:$0xff] }
 0x10f   :  { %v328_v41 = vadd.f32 %v260_v23, %v160_v21  ;;  %v370_v52 = vadd.f32 %v3900_v24, %v331_v26  ;;  %v1540_v23 = vld [vmem:[%s4520_s8] sm:$0x3] }
 0x110   :  { %954 = vadd.xlane.f32.xlu0 %v953_v32  ;;  %v165_v32 = vld [vmem:[%s4512_s0 + $0x90] sm:$0xff]  ;;  %v4035_v62 = vrot.slane %v1540_v23, %v4528_v30 }
 0x111   :  { %v367_v49 = vadd.f32 %v3900_v24, %v328_v41  ;;  %v4527_v41 = vsub.s32 1, %v4014_v6 }
 0x112   :  { %2110 = vperm.xlu1 %3085, %v361_v5   ;;  %v266_v54 = vpop.xlane.xlu1 %265  ;;  %v275_v35 = vpop.xlane.xlu0 %274 }
 0x113   :  { %v330_v27 = vadd.f32 %v266_v54, %v162_v60  ;;  %v333_v33 = vadd.f32 %v275_v35, %v165_v32  ;;  %v4040_v60 = vrot.slane %v1540_v23, %v4527_v41 }
 0x114   :  { %960 = vadd.xlane.f32.xlu0 %v959_v58 }
 0x115   :  { %v369_v57 = vadd.f32 %v3900_v24, %v330_v27  ;;  %v372_v55 = vadd.f32 %v3900_v24, %v333_v33 }
 0x116   :  { %2115 = vperm.xlu1 %3085, %v362_v18   ;;  %v272_v38 = vpop.xlane.xlu1 %271  ;;  %v281_v31 = vpop.xlane.xlu0 %280 }
 0x117   :  { %v332_v56 = vadd.f32 %v272_v38, %v164_v63  ;;  %v335_v2 = vadd.f32 %v281_v31, %v167_v44  ;;  %v3136_v63 = vld [vmem:[%s4523_s11] sm:$0xff]  }
 0x118   :  { %2968 = vmatprep.subr.bf16.mxu0 %v3136_v63 }
 0x119   :  { %v371_v58 = vadd.f32 %v3900_v24, %v332_v56  ;;  %v374_v50 = vadd.f32 %v3900_v24, %v335_v2 }
 0x11a   :  { %2125 = vperm.xlu1 %3085, %v364_v14   ;;  %v278_v59 = vpop.xlane.xlu1 %277  ;;  %v287_v39 = vpop.xlane.xlu0 %286 }
 0x11b   :  { %v334_v36 = vadd.f32 %v278_v59, %v166_v47  ;;  %v337_v9 = vadd.f32 %v287_v39, %v169_v34 }
 0x11d   :  { %v373_v53 = vadd.f32 %v3900_v24, %v334_v36  ;;  %v376_v4 = vadd.f32 %v3900_v24, %v337_v9  ;;  %v3137_v36 = vld [vmem:[%s4523_s11 + $0x8] sm:$0xff]   ;;  %v2938_v9 = vpop.f32.mrb[0].mxu0 }
 0x11e   :  { %2135 = vperm.xlu1 %3085, %v366_v46   ;;  %v284_v0 = vpop.xlane.xlu1 %283  ;;  %v293_v5 = vpop.xlane.xlu0 %292  ;;  %v174_v46 = vld [vmem:[%s4512_s0 + $0xd8] sm:$0xff] }
 0x11f   :  { %v336_v1 = vadd.f32 %v284_v0, %v168_v61  ;;  %v339_v42 = vadd.f32 %v293_v5, %v171_v3  ;;  %v581_v0 = vpop.f32.mrb[1].mxu0  ;;  %v3138_v3 = vld [vmem:[%s4523_s11 + $0x10] sm:$0xff]  }
 0x121   :  { %v375_v37 = vadd.f32 %v3900_v24, %v336_v1  ;;  %v378_v18 = vadd.f32 %v3900_v24, %v339_v42 }
 0x122   :  { %2145 = vperm.xlu1 %3085, %v368_v25   ;;  %v290_v8 = vpop.xlane.xlu1 %289  ;;  %v299_v12 = vpop.xlane.xlu0 %298  ;;  %v176_v25 = vld [vmem:[%s4512_s0 + $0xe8] sm:$0xff] }
 0x123   :  { %v341_v13 = vadd.f32 %v299_v12, %v173_v11  ;;  %v3139_v11 = vld [vmem:[%s4523_s11 + $0x18] sm:$0xff]  }
 0x125   :  { %v380_v15 = vadd.f32 %v3900_v24, %v341_v13 }
 0x126   :  { %2155 = vperm.xlu1 %3085, %v370_v52   ;;  %v296_v14 = vpop.xlane.xlu1 %295  ;;  %v305_v29 = vpop.xlane.xlu0 %304 }
 0x127   :  { %v343_v17 = vadd.f32 %v305_v29, %v175_v16 }
 0x129   :  { %v382_v20 = vadd.f32 %v3900_v24, %v343_v17 }
 0x12a   :  { %2075 = vperm.xlu0 %3084, %v354_v40   ;;  %2165 = vperm.xlu1 %3085, %v372_v55   ;;  %v338_v40 = vadd.f32 %v290_v8, %v170_v7 }
 0x12c   :  { %v377_v10 = vadd.f32 %v3900_v24, %v338_v40 }
 0x12e   :  { %2120 = vperm.xlu0 %3084, %v363_v43   ;;  %2175 = vperm.xlu1 %3085, %v374_v50   ;;  %v340_v43 = vadd.f32 %v296_v14, %v172_v19 }
 0x130   :  { %v379_v48 = vadd.f32 %v3900_v24, %v340_v43 }
 0x132   :  { %2130 = vperm.xlu0 %3084, %v365_v22   ;;  %2185 = vperm.xlu1 %3085, %v376_v4   ;;  %v302_v22 = vpop.xlane.xlu1 %301 }
 0x133   :  { %v342_v51 = vadd.f32 %v302_v22, %v174_v46 }
 0x135   :  { %v381_v21 = vadd.f32 %v3900_v24, %v342_v51 }
 0x136   :  { %2140 = vperm.xlu0 %3084, %v367_v49   ;;  %2195 = vperm.xlu1 %3085, %v378_v18   ;;  %v308_v49 = vpop.xlane.xlu1 %307 }
 0x137   :  { %v344_v28 = vadd.f32 %v308_v49, %v176_v25  ;;  %v710_v49 = vmul.f32 %v2938_v9, %v2938_v9 }
 0x139   :  { %v383_v26 = vadd.f32 %v3900_v24, %v344_v28 }
 0x13a   :  { %2150 = vperm.xlu0 %3084, %v369_v57   ;;  %2205 = vperm.xlu1 %3085, %v380_v15  }
 0x13e   :  { %2160 = vperm.xlu0 %3084, %v371_v58   ;;  %2215 = vperm.xlu1 %3085, %v382_v20  }
 0x142   :  { %2170 = vperm.xlu0 %3084, %v373_v53  }
 0x146   :  { %2180 = vperm.xlu0 %3084, %v375_v37   ;;  %v2939_v37 = vpop.f32.mrb[2].mxu0 }
 0x147   :  { %v584_v7 = vpop.f32.mrb[3].mxu0 }
 0x148   :  { %v2942_v43 = vpop.f32.mrb[4].mxu0 }
 0x14a   :  { %2190 = vperm.xlu0 %3084, %v377_v10  }
 0x14e   :  { %2200 = vperm.xlu0 %3084, %v379_v48   ;;  %v597_v48 = vpop.f32.mrb[5].mxu0 }
 0x14f   :  { %v2943_v17 = vpop.f32.mrb[6].mxu0 }
 0x150   :  { %v600_v51 = vpop.f32.mrb[7].mxu0 }
 0x152   :  { %2210 = vperm.xlu0 %3084, %v381_v21   ;;  %v711_v21 = vmul.f32 %v2939_v37, %v2939_v37 }
 0x156   :  { %2220 = vperm.xlu0 %3084, %v383_v26  }
 0x15d   :  { %v1381_v54 = vpop.f32.mrb[0].mxu1 }
 0x15e   :  { %v1552_v27 = vadd.f32 %v4035_v62, %v1381_v54  ;;  %v1383_v52 = vpop.f32.mrb[1].mxu1 }
 0x15f   :  { %v1553_v57 = vadd.f32 %v4040_v60, %v1383_v52  ;;  %v1385_v32 = vpop.f32.mrb[2].mxu1 }
 0x160   :  { %v1554_v35 = vadd.f32 %v4035_v62, %v1385_v32  ;;  %v1387_v33 = vpop.f32.mrb[3].mxu1  ;;  %v1616_v38 = vmax.f32 %v1552_v27, 0.0  ;;  %v709_v32 = vmul.f32 %v584_v7, %v584_v7 }
 0x161   :  { %v1555_v24 = vadd.f32 %v4040_v60, %v1387_v33  ;;  %v1617_v55 = vmax.f32 %v1553_v57, 0.0  ;;  %v2946_v33 = vpop.f32.mrb[8].mxu0 }
 0x162   :  { %v1618_v56 = vmax.f32 %v1554_v35, 0.0  ;;  %v750_v35 = vsel %vm740_vm3, %v711_v21, 0.0 }
 0x163   :  { %v1619_v58 = vmax.f32 %v1555_v24, 0.0  ;;  %v708_v24 = vmul.f32 %v581_v0, %v581_v0  ;;  %751 = vadd.xlane.f32.xlu1 %v750_v35 }
 0x164   :  { %v1680_v44 = vpack.c.bf16 %v1618_v56, %v1616_v38  ;;  %v747_v38 = vsel %vm740_vm3, %v710_v49, 0.0  ;;  %v613_v56 = vpop.f32.mrb[9].mxu0 }
 0x165   :  { %v1681_v31 = vpack.c.bf16 %v1619_v58, %v1617_v55  ;;  %v1391_v2 = vpop.f32.mrb[4].mxu1  ;;  %v741_v9 = vsel %vm740_vm3, %v708_v24, 0.0 }
 0x166   :  { %v1556_v47 = vadd.f32 %v4035_v62, %v1391_v2  ;;  %v1393_v59 = vpop.f32.mrb[5].mxu1 }
 0x167   :  { %v1557_v50 = vadd.f32 %v4040_v60, %v1393_v59  ;;  %v1395_v53 = vpop.f32.mrb[6].mxu1  ;;  %1879 = vmatprep.mubr.bf16.mxu0 %v1681_v31 }
 0x168   :  { %v1558_v34 = vadd.f32 %v4035_v62, %v1395_v53  ;;  %v1397_v39 = vpop.f32.mrb[7].mxu1  ;;  %1880 = vmatmul.mubr.bf16.vlgmr.msra.gmra.mrb[32].mxu0 %v1680_v44  ;;  %v1620_v1 = vmax.f32 %v1556_v47, 0.0  ;;  %v2947_v44 = vpop.f32.mrb[10].mxu0 }
 0x169   :  { %v1559_v61 = vadd.f32 %v4040_v60, %v1397_v39  ;;  %2969 = vmatpush3.bf16.msra.mxu0 %v3136_v63  ;;  %v1621_v5 = vmax.f32 %v1557_v50, 0.0  ;;  %v616_v47 = vpop.f32.mrb[11].mxu0  ;;  %v744_v50 = vsel %vm740_vm3, %v709_v32, 0.0  ;;  %v714_v39 = vmul.f32 %v2942_v43, %v2942_v43 }
 0x16a   :  { %v1622_v4 = vmax.f32 %v1558_v34, 0.0  ;;  %2970 = vmatprep.subr.bf16.mxu0 %v3137_v36  ;;  %745 = vadd.xlane.f32.xlu1 %v744_v50  ;;  %v2950_v7 = vpop.f32.mrb[12].mxu0  ;;  %v717_v49 = vmul.f32 %v616_v47, %v616_v47 }
 0x16b   :  { %v1623_v42 = vmax.f32 %v1559_v61, 0.0  ;;  %v722_v47 = vmul.f32 %v2950_v7, %v2950_v7 }
 0x16c   :  { %v1682_v8 = vpack.c.bf16 %v1622_v4, %v1620_v1 }
 0x16d   :  { %v1683_v40 = vpack.c.bf16 %v1623_v42, %v1621_v5  ;;  %v1401_v18 = vpop.f32.mrb[8].mxu1  ;;  %2971 = vmatpush3.bf16.msra.mxu0 %v3137_v36  ;;  %v715_v36 = vmul.f32 %v2943_v17, %v2943_v17  ;;  %v713_v5 = vmul.f32 %v600_v51, %v600_v51 }
 0x16e   :  { %v1560_v45 = vadd.f32 %v4035_v62, %v1401_v18  ;;  %v1403_v10 = vpop.f32.mrb[9].mxu1  ;;  %2972 = vmatprep.subr.bf16.mxu0 %v3138_v3  ;;  %v759_v18 = vsel %vm740_vm3, %v714_v39, 0.0 }
 0x16f   :  { %v1561_v12 = vadd.f32 %v4040_v60, %v1403_v10  ;;  %v1405_v13 = vpop.f32.mrb[10].mxu1  ;;  %1887 = vmatprep.mubr.bf16.mxu0 %v1683_v40  ;;  %v762_v42 = vsel %vm740_vm3, %v715_v36, 0.0  ;;  %v712_v40 = vmul.f32 %v597_v48, %v597_v48 }
 0x170   :  { %v1562_v19 = vadd.f32 %v4035_v62, %v1405_v13  ;;  %v1407_v14 = vpop.f32.mrb[11].mxu1  ;;  %1888 = vmatmul.mubr.bf16.gmra.mrb[36].mxu0 %v1682_v8  ;;  %v1624_v16 = vmax.f32 %v1560_v45, 0.0  ;;  %v629_v45 = vpop.f32.mrb[13].mxu0  ;;  %763 = vadd.xlane.f32.xlu1 %v762_v42 }
 0x171   :  { %v1563_v15 = vadd.f32 %v4040_v60, %v1407_v14  ;;  %2973 = vmatpush3.bf16.msra.mxu0 %v3138_v3  ;;  %v1625_v46 = vmax.f32 %v1561_v12, 0.0  ;;  %v2951_v12 = vpop.f32.mrb[14].mxu0  ;;  %v753_v48 = vsel %vm740_vm3, %v712_v40, 0.0 }
 0x172   :  { %v1626_v29 = vmax.f32 %v1562_v19, 0.0  ;;  %2974 = vmatprep.subr.bf16.mxu0 %v3139_v11  ;;  %v632_v14 = vpop.f32.mrb[15].mxu0 }
 0x173   :  { %v1627_v22 = vmax.f32 %v1563_v15, 0.0  ;;  %v719_v15 = vmul.f32 %v2947_v44, %v2947_v44  ;;  %v768_v44 = vsel %vm740_vm3, %v717_v49, 0.0 }
 0x174   :  { %v1684_v20 = vpack.c.bf16 %v1626_v29, %v1624_v16  ;;  %v756_v16 = vsel %vm740_vm3, %v713_v5, 0.0 }
 0x175   :  { %v1685_v23 = vpack.c.bf16 %v1627_v22, %v1625_v46  ;;  %v1411_v25 = vpop.f32.mrb[12].mxu1  ;;  %2975 = vmatpush3.bf16.msra.mxu0 %v3139_v11  ;;  %748 = vadd.xlane.f32.xlu0 %v747_v38  ;;  %v718_v46 = vmul.f32 %v2946_v33, %v2946_v33 }
 0x176   :  { %v1564_v28 = vadd.f32 %v4035_v62, %v1411_v25  ;;  %v1413_v26 = vpop.f32.mrb[13].mxu1  ;;  %757 = vadd.xlane.f32.xlu1 %v756_v16 }
 0x177   :  { %v1565_v54 = vadd.f32 %v4040_v60, %v1413_v26  ;;  %v1415_v27 = vpop.f32.mrb[14].mxu1  ;;  %1895 = vmatprep.mubr.bf16.mxu0 %v1685_v23  ;;  %v2954_v26 = vpop.f32.mrb[16].mxu0 }
 0x178   :  { %v1566_v52 = vadd.f32 %v4035_v62, %v1415_v27  ;;  %v1417_v57 = vpop.f32.mrb[15].mxu1  ;;  %1896 = vmatmul.mubr.bf16.gmra.mrb[40].mxu0 %v1684_v20  ;;  %v1628_v55 = vmax.f32 %v1564_v28, 0.0  ;;  %v774_v28 = vsel %vm740_vm3, %v719_v15, 0.0  ;;  %v716_v27 = vmul.f32 %v613_v56, %v613_v56 }
 0x179   :  { %v1567_v63 = vadd.f32 %v4040_v60, %v1417_v57  ;;  %v1629_v31 = vmax.f32 %v1565_v54, 0.0  ;;  %742 = vadd.xlane.f32.xlu0 %v741_v9  ;;  %v645_v57 = vpop.f32.mrb[17].mxu0  ;;  %v721_v9 = vmul.f32 %v632_v14, %v632_v14  ;;  %v726_v14 = vmul.f32 %v2954_v26, %v2954_v26 }
 0x17a   :  { %v1630_v58 = vmax.f32 %v1566_v52, 0.0  ;;  %v771_v52 = vsel %vm740_vm3, %v718_v46, 0.0  ;;  %v2955_v33 = vpop.f32.mrb[18].mxu0  ;;  %775 = vadd.xlane.f32.xlu1 %v774_v28  ;;  %v765_v56 = vsel %vm740_vm3, %v716_v27, 0.0 }
 0x17b   :  { %v1631_v2 = vmax.f32 %v1567_v63, 0.0  ;;  %v648_v38 = vpop.f32.mrb[19].mxu0 }
 0x17c   :  { %v1686_v59 = vpack.c.bf16 %v1630_v58, %v1628_v55  ;;  %v723_v58 = vmul.f32 %v2951_v12, %v2951_v12  ;;  %v780_v12 = vsel %vm740_vm3, %v721_v9, 0.0 }
 0x17d   :  { %v1687_v53 = vpack.c.bf16 %v1631_v2, %v1629_v31  ;;  %v1421_v34 = vpop.f32.mrb[16].mxu1  ;;  %760 = vadd.xlane.f32.xlu0 %v759_v18 }
 0x17e   :  { %v1568_v61 = vadd.f32 %v4035_v62, %v1421_v34  ;;  %v1423_v0 = vpop.f32.mrb[17].mxu1  ;;  %769 = vadd.xlane.f32.xlu1 %v768_v44 }
 0x17f   :  { %v1569_v1 = vadd.f32 %v4040_v60, %v1423_v0  ;;  %v1425_v4 = vpop.f32.mrb[18].mxu1  ;;  %1903 = vmatprep.mubr.bf16.mxu0 %v1687_v53  ;;  %v2958_v0 = vpop.f32.mrb[20].mxu0 }
 0x180   :  { %v1570_v37 = vadd.f32 %v4035_v62, %v1425_v4  ;;  %v1427_v3 = vpop.f32.mrb[19].mxu1  ;;  %1904 = vmatmul.mubr.bf16.gmra.mrb[44].mxu0 %v1686_v59  ;;  %v1632_v10 = vmax.f32 %v1568_v61, 0.0  ;;  %v786_v61 = vsel %vm740_vm3, %v723_v58, 0.0  ;;  %v720_v4 = vmul.f32 %v629_v45, %v629_v45 }
 0x181   :  { %v1571_v8 = vadd.f32 %v4040_v60, %v1427_v3  ;;  %v1633_v13 = vmax.f32 %v1569_v1, 0.0  ;;  %754 = vadd.xlane.f32.xlu0 %v753_v48  ;;  %v661_v3 = vpop.f32.mrb[21].mxu0  ;;  %v725_v48 = vmul.f32 %v648_v38, %v648_v38  ;;  %v730_v38 = vmul.f32 %v2958_v0, %v2958_v0 }
 0x182   :  { %v1634_v11 = vmax.f32 %v1570_v37, 0.0  ;;  %v783_v37 = vsel %vm740_vm3, %v722_v47, 0.0  ;;  %v2959_v7 = vpop.f32.mrb[22].mxu0  ;;  %787 = vadd.xlane.f32.xlu1 %v786_v61  ;;  %v777_v45 = vsel %vm740_vm3, %v720_v4, 0.0 }
 0x183   :  { %v1635_v19 = vmax.f32 %v1571_v8, 0.0  ;;  %v664_v18 = vpop.f32.mrb[23].mxu0 }
 0x184   :  { %v1688_v43 = vpack.c.bf16 %v1634_v11, %v1632_v10  ;;  %v727_v11 = vmul.f32 %v2955_v33, %v2955_v33  ;;  %v792_v33 = vsel %vm740_vm3, %v725_v48, 0.0 }
 0x185   :  { %v1689_v29 = vpack.c.bf16 %v1635_v19, %v1633_v13  ;;  %v1431_v17 = vpop.f32.mrb[20].mxu1  ;;  %772 = vadd.xlane.f32.xlu0 %v771_v52 }
 0x186   :  { %v1572_v22 = vadd.f32 %v4035_v62, %v1431_v17  ;;  %v1433_v51 = vpop.f32.mrb[21].mxu1  ;;  %781 = vadd.xlane.f32.xlu1 %v780_v12 }
 0x187   :  { %v1573_v20 = vadd.f32 %v4040_v60, %v1433_v51  ;;  %v1435_v21 = vpop.f32.mrb[22].mxu1  ;;  %1911 = vmatprep.mubr.bf16.mxu0 %v1689_v29  ;;  %v2962_v51 = vpop.f32.mrb[24].mxu0 }
 0x188   :  { %v1574_v23 = vadd.f32 %v4035_v62, %v1435_v21  ;;  %v1437_v25 = vpop.f32.mrb[23].mxu1  ;;  %1912 = vmatmul.mubr.bf16.gmra.mrb[48].mxu0 %v1688_v43  ;;  %v1636_v32 = vmax.f32 %v1572_v22, 0.0  ;;  %v798_v22 = vsel %vm740_vm3, %v727_v11, 0.0  ;;  %v724_v21 = vmul.f32 %v645_v57, %v645_v57 }
 0x189   :  { %v1575_v54 = vadd.f32 %v4040_v60, %v1437_v25  ;;  %v1637_v63 = vmax.f32 %v1573_v20, 0.0  ;;  %766 = vadd.xlane.f32.xlu0 %v765_v56  ;;  %v677_v25 = vpop.f32.mrb[25].mxu0  ;;  %v729_v56 = vmul.f32 %v664_v18, %v664_v18  ;;  %v734_v18 = vmul.f32 %v2962_v51, %v2962_v51 }
 0x18a   :  { %v1638_v35 = vmax.f32 %v1574_v23, 0.0  ;;  %v795_v23 = vsel %vm740_vm3, %v726_v14, 0.0  ;;  %v2963_v26 = vpop.f32.mrb[26].mxu0  ;;  %799 = vadd.xlane.f32.xlu1 %v798_v22  ;;  %v789_v57 = vsel %vm740_vm3, %v724_v21, 0.0 }
 0x18b   :  { %v1639_v24 = vmax.f32 %v1575_v54, 0.0  ;;  %v680_v52 = vpop.f32.mrb[27].mxu0 }
 0x18c   :  { %v1690_v55 = vpack.c.bf16 %v1638_v35, %v1636_v32  ;;  %v731_v35 = vmul.f32 %v2959_v7, %v2959_v7  ;;  %v804_v7 = vsel %vm740_vm3, %v729_v56, 0.0 }
 0x18d   :  { %v1691_v31 = vpack.c.bf16 %v1639_v24, %v1637_v63  ;;  %v1441_v2 = vpop.f32.mrb[24].mxu1  ;;  %784 = vadd.xlane.f32.xlu0 %v783_v37 }
 0x18e   :  { %v1576_v59 = vadd.f32 %v4035_v62, %v1441_v2  ;;  %v1443_v36 = vpop.f32.mrb[25].mxu1  ;;  %793 = vadd.xlane.f32.xlu1 %v792_v33 }
 0x18f   :  { %v1577_v50 = vadd.f32 %v4040_v60, %v1443_v36  ;;  %v1445_v53 = vpop.f32.mrb[26].mxu1  ;;  %1919 = vmatprep.mubr.bf16.mxu0 %v1691_v31  ;;  %v2966_v36 = vpop.f32.mrb[28].mxu0 }
 0x190   :  { %v1578_v34 = vadd.f32 %v4035_v62, %v1445_v53  ;;  %v1447_v39 = vpop.f32.mrb[27].mxu1  ;;  %1920 = vmatmul.mubr.bf16.gmra.mrb[52].mxu0 %v1690_v55  ;;  %v1640_v5 = vmax.f32 %v1576_v59, 0.0  ;;  %v810_v59 = vsel %vm740_vm3, %v731_v35, 0.0  ;;  %v728_v53 = vmul.f32 %v661_v3, %v661_v3 }
 0x191   :  { %v1579_v1 = vadd.f32 %v4040_v60, %v1447_v39  ;;  %v1641_v8 = vmax.f32 %v1577_v50, 0.0  ;;  %778 = vadd.xlane.f32.xlu0 %v777_v45  ;;  %v693_v39 = vpop.f32.mrb[29].mxu0  ;;  %v733_v45 = vmul.f32 %v680_v52, %v680_v52 }
 0x192   :  { %v1642_v42 = vmax.f32 %v1578_v34, 0.0  ;;  %v807_v34 = vsel %vm740_vm3, %v730_v38, 0.0  ;;  %v2967_v0 = vpop.f32.mrb[30].mxu0  ;;  %811 = vadd.xlane.f32.xlu1 %v810_v59  ;;  %v801_v3 = vsel %vm740_vm3, %v728_v53, 0.0  ;;  %v4127_v38 = vpop.xlane.xlu1 %313 }
 0x193   :  { %v1643_v40 = vmax.f32 %v1579_v1, 0.0  ;;  %v696_v37 = vpop.f32.mrb[31].mxu0  ;;  %v816_v21 = vsel %vm740_vm3, %v733_v45, 0.0 }
 0x194   :  { %v1692_v10 = vpack.c.bf16 %v1642_v42, %v1640_v5  ;;  %v735_v42 = vmul.f32 %v2963_v26, %v2963_v26  ;;  %v737_v33 = vmul.f32 %v696_v37, %v696_v37 }
 0x195   :  { %v1693_v13 = vpack.c.bf16 %v1643_v40, %v1641_v8  ;;  %v1451_v19 = vpop.f32.mrb[28].mxu1  ;;  %796 = vadd.xlane.f32.xlu0 %v795_v23 }
 0x196   :  { %v1580_v43 = vadd.f32 %v4035_v62, %v1451_v19  ;;  %v1453_v15 = vpop.f32.mrb[29].mxu1  ;;  %805 = vadd.xlane.f32.xlu1 %v804_v7  ;;  %v828_v56 = vsel %vm740_vm3, %v737_v33, 0.0 }
 0x197   :  { %v1581_v16 = vadd.f32 %v4040_v60, %v1453_v15  ;;  %v1455_v29 = vpop.f32.mrb[30].mxu1  ;;  %1927 = vmatprep.mubr.bf16.mxu0 %v1693_v13 }
 0x198   :  { %v1582_v17 = vadd.f32 %v4035_v62, %v1455_v29  ;;  %v1457_v46 = vpop.f32.mrb[31].mxu1  ;;  %1928 = vmatmul.mubr.bf16.gmra.mrb[56].mxu0 %v1692_v10  ;;  %v1644_v49 = vmax.f32 %v1580_v43, 0.0  ;;  %v822_v43 = vsel %vm740_vm3, %v735_v42, 0.0  ;;  %v819_v29 = vsel %vm740_vm3, %v734_v18, 0.0 }
 0x199   :  { %v1583_v20 = vadd.f32 %v4040_v60, %v1457_v46  ;;  %v1645_v54 = vmax.f32 %v1581_v16, 0.0  ;;  %790 = vadd.xlane.f32.xlu0 %v789_v57  ;;  %v732_v16 = vmul.f32 %v677_v25, %v677_v25  ;;  %v736_v57 = vmul.f32 %v693_v39, %v693_v39 }
 0x19a   :  { %v1646_v28 = vmax.f32 %v1582_v17, 0.0  ;;  %823 = vadd.xlane.f32.xlu1 %v822_v43 }
 0x19b   :  { %v1647_v27 = vmax.f32 %v1583_v20, 0.0  ;;  %v739_v20 = vmul.f32 %v2967_v0, %v2967_v0  ;;  %v813_v26 = vsel %vm740_vm3, %v732_v16, 0.0 }
 0x19c   :  { %v1694_v32 = vpack.c.bf16 %v1646_v28, %v1644_v49  ;;  %v738_v28 = vmul.f32 %v2966_v36, %v2966_v36 }
 0x19d   :  { %v1695_v63 = vpack.c.bf16 %v1647_v27, %v1645_v54  ;;  %v1461_v24 = vpop.f32.mrb[32].mxu1  ;;  %808 = vadd.xlane.f32.xlu0 %v807_v34 }
 0x19e   :  { %v1584_v55 = vadd.f32 %v4035_v62, %v1461_v24  ;;  %v1463_v58 = vpop.f32.mrb[33].mxu1  ;;  %817 = vadd.xlane.f32.xlu1 %v816_v21  ;;  %v3160_v21 = vld [vmem:[#allocation2] ss:$0 sm:$0xff] }
 0x19f   :  { %v1585_v44 = vadd.f32 %v4040_v60, %v1463_v58  ;;  %v1465_v31 = vpop.f32.mrb[34].mxu1  ;;  %1935 = vmatprep.mubr.bf16.mxu0 %v1695_v63  ;;  %v834_v63 = vsel %vm740_vm3, %v739_v20, 0.0 }
 0x1a0   :  { %v1586_v2 = vadd.f32 %v4035_v62, %v1465_v31  ;;  %v1467_v47 = vpop.f32.mrb[35].mxu1  ;;  %1936 = vmatmul.mubr.bf16.gmra.mrb[60].mxu0 %v1694_v32  ;;  %v1648_v9 = vmax.f32 %v1584_v55, 0.0  ;;  %v831_v55 = vsel %vm740_vm3, %v738_v28, 0.0 }
 0x1a1   :  { %v1587_v50 = vadd.f32 %v4040_v60, %v1467_v47  ;;  %v1649_v1 = vmax.f32 %v1585_v44, 0.0  ;;  %802 = vadd.xlane.f32.xlu0 %v801_v3  ;;  %v177_v3 = vld [vmem:[%s4512_s0 + $0xf0] sm:$0xff] }
 0x1a2   :  { %v1650_v61 = vmax.f32 %v1586_v2, 0.0  ;;  %835 = vadd.xlane.f32.xlu1 %v834_v63 }
 0x1a3   :  { %v1651_v4 = vmax.f32 %v1587_v50, 0.0  ;;  %v825_v50 = vsel %vm740_vm3, %v736_v57, 0.0  ;;  %v3143_v57 = vld [vmem:[%s4523_s11 + $0x38] sm:$0xff]  }
 0x1a4   :  { %v1696_v5 = vpack.c.bf16 %v1650_v61, %v1648_v9  ;;  %v4134_v61 = vpop.xlane.xlu1 %873 }
 0x1a5   :  { %v1697_v8 = vpack.c.bf16 %v1651_v4, %v1649_v1  ;;  %v1471_v40 = vpop.f32.mrb[36].mxu1  ;;  %820 = vadd.xlane.f32.xlu0 %v819_v29  ;;  %v3141_v29 = vld [vmem:[%s4523_s11 + $0x28] sm:$0xff]  }
 0x1a6   :  { %v1588_v10 = vadd.f32 %v4035_v62, %v1471_v40  ;;  %v1473_v11 = vpop.f32.mrb[37].mxu1  ;;  %829 = vadd.xlane.f32.xlu1 %v828_v56 }
 0x1a7   :  { %v1589_v12 = vadd.f32 %v4040_v60, %v1473_v11  ;;  %v1475_v13 = vpop.f32.mrb[38].mxu1  ;;  %1943 = vmatprep.mubr.bf16.mxu0 %v1697_v8 }
 0x1a8   :  { %v1590_v19 = vadd.f32 %v4035_v62, %v1475_v13  ;;  %v1477_v14 = vpop.f32.mrb[39].mxu1  ;;  %1944 = vmatmul.mubr.bf16.gmra.mrb[64].mxu0 %v1696_v5  ;;  %v1652_v17 = vmax.f32 %v1588_v10, 0.0  ;;  %v3140_v10 = vld [vmem:[%s4523_s11 + $0x20] sm:$0xff]   ;;  %v4161_v63 = vpop.xlane.xlu1 %879 }
 0x1a9   :  { %v1591_v15 = vadd.f32 %v4040_v60, %v1477_v14  ;;  %v1653_v48 = vmax.f32 %v1589_v12, 0.0  ;;  %814 = vadd.xlane.f32.xlu0 %v813_v26  ;;  %v311_v14 = vpop.xlane.xlu0 %310  ;;  %2976 = vmatprep.subr.bf16.mxu0 %v3140_v10  ;;  %v3142_v26 = vld [vmem:[%s4523_s11 + $0x30] sm:$0xff]  }
 0x1aa   :  { %v1654_v46 = vmax.f32 %v1590_v19, 0.0  ;;  %2977 = vmatpush3.bf16.msra.mxu0 %v3140_v10 }
 0x1ab   :  { %v1655_v22 = vmax.f32 %v1591_v15, 0.0  ;;  %v345_v15 = vadd.f32 %v311_v14, %v177_v3  ;;  %2978 = vmatprep.subr.bf16.mxu0 %v3141_v29 }
 0x1ac   :  { %v1698_v51 = vpack.c.bf16 %v1654_v46, %v1652_v17 }
 0x1ad   :  { %v1699_v23 = vpack.c.bf16 %v1655_v22, %v1653_v48  ;;  %v1481_v49 = vpop.f32.mrb[40].mxu1  ;;  %832 = vadd.xlane.f32.xlu0 %v831_v55 }
 0x1ae   :  { %v1592_v54 = vadd.f32 %v4035_v62, %v1481_v49  ;;  %v1483_v25 = vpop.f32.mrb[41].mxu1  ;;  %2979 = vmatpush3.bf16.msra.mxu0 %v3141_v29  ;;  %v4178_v29 = vld [vmem:[%s4522_s10] ss:$0 sm:$0xff] }
 0x1af   :  { %v1593_v27 = vadd.f32 %v4040_v60, %v1483_v25  ;;  %v1485_v52 = vpop.f32.mrb[42].mxu1  ;;  %1951 = vmatprep.mubr.bf16.mxu0 %v1699_v23  ;;  %v384_v23 = vadd.f32 %v3160_v21, %v345_v15  ;;  %2980 = vmatprep.subr.bf16.mxu0 %v3142_v26 }
 0x1b0   :  { %v1594_v32 = vadd.f32 %v4035_v62, %v1485_v52  ;;  %v1487_v35 = vpop.f32.mrb[43].mxu1  ;;  %1952 = vmatmul.mubr.bf16.gmra.mrb[68].mxu0 %v1698_v51  ;;  %v1656_v58 = vmax.f32 %v1592_v54, 0.0  ;;  %v178_v51 = vld [vmem:[%s4512_s0 + $0xf8] sm:$0xff] }
 0x1b1   :  { %v1595_v24 = vadd.f32 %v4040_v60, %v1487_v35  ;;  %v1657_v31 = vmax.f32 %v1593_v27, 0.0  ;;  %826 = vadd.xlane.f32.xlu0 %v825_v50  ;;  %v346_v27 = vadd.f32 %v4127_v38, %v178_v51 }
 0x1b2   :  { %v1658_v44 = vmax.f32 %v1594_v32, 0.0  ;;  %2981 = vmatpush3.bf16.msra.mxu0 %v3142_v26 }
 0x1b3   :  { %v1659_v2 = vmax.f32 %v1595_v24, 0.0  ;;  %2982 = vmatprep.subr.bf16.mxu0 %v3143_v57 }
 0x1b4   :  { %v1700_v47 = vpack.c.bf16 %v1658_v44, %v1656_v58  ;;  %v385_v58 = vadd.f32 %v3160_v21, %v346_v27 }
 0x1b5   :  { %v1701_v59 = vpack.c.bf16 %v1659_v2, %v1657_v31  ;;  %v1491_v36 = vpop.f32.mrb[44].mxu1 }
 0x1b6   :  { %v1596_v53 = vadd.f32 %v4035_v62, %v1491_v36  ;;  %v1493_v34 = vpop.f32.mrb[45].mxu1  ;;  %2983 = vmatpush3.bf16.msra.mxu0 %v3143_v57 }
 0x1b7   :  { %v1597_v39 = vadd.f32 %v4040_v60, %v1493_v34  ;;  %v1495_v9 = vpop.f32.mrb[46].mxu1  ;;  %1959 = vmatprep.mubr.bf16.mxu0 %v1701_v59  ;;  %2225 = vperm.xlu1 %3085, %v384_v23  }
 0x1b8   :  { %v1598_v0 = vadd.f32 %v4035_v62, %v1495_v9  ;;  %v1497_v1 = vpop.f32.mrb[47].mxu1  ;;  %1960 = vmatmul.mubr.bf16.gmra.mrb[72].mxu0 %v1700_v47  ;;  %v1660_v37 = vmax.f32 %v1596_v53, 0.0 }
 0x1b9   :  { %v1599_v4 = vadd.f32 %v4040_v60, %v1497_v1  ;;  %v1661_v42 = vmax.f32 %v1597_v39, 0.0 }
 0x1ba   :  { %v1662_v5 = vmax.f32 %v1598_v0, 0.0 }
 0x1bb   :  { %v1663_v7 = vmax.f32 %v1599_v4, 0.0 }
 0x1bc   :  { %v1702_v8 = vpack.c.bf16 %v1662_v5, %v1660_v37 }
 0x1bd   :  { %v1703_v40 = vpack.c.bf16 %v1663_v7, %v1661_v42  ;;  %v1501_v18 = vpop.f32.mrb[48].mxu1 }
 0x1be   :  { %v1600_v11 = vadd.f32 %v4035_v62, %v1501_v18  ;;  %v1503_v12 = vpop.f32.mrb[49].mxu1 }
 0x1bf   :  { %v1601_v13 = vadd.f32 %v4040_v60, %v1503_v12  ;;  %v1505_v19 = vpop.f32.mrb[50].mxu1  ;;  %1967 = vmatprep.mubr.bf16.mxu0 %v1703_v40 }
 0x1c0   :  { %v1602_v45 = vadd.f32 %v4035_v62, %v1505_v19  ;;  %v1507_v43 = vpop.f32.mrb[51].mxu1  ;;  %1968 = vmatmul.mubr.bf16.gmra.mrb[76].mxu0 %v1702_v8  ;;  %v1664_v17 = vmax.f32 %v1600_v11, 0.0 }
 0x1c1   :  { %v1603_v16 = vadd.f32 %v4040_v60, %v1507_v43  ;;  %v1665_v48 = vmax.f32 %v1601_v13, 0.0 }
 0x1c2   :  { %v1666_v46 = vmax.f32 %v1602_v45, 0.0 }
 0x1c3   :  { %v1667_v22 = vmax.f32 %v1603_v16, 0.0 }
 0x1c4   :  { %v1704_v20 = vpack.c.bf16 %v1666_v46, %v1664_v17 }
 0x1c5   :  { %v1705_v49 = vpack.c.bf16 %v1667_v22, %v1665_v48  ;;  %v1511_v28 = vpop.f32.mrb[52].mxu1 }
 0x1c6   :  { %v1604_v54 = vadd.f32 %v4035_v62, %v1511_v28  ;;  %v1513_v25 = vpop.f32.mrb[53].mxu1 }
 0x1c7   :  { %v1605_v52 = vadd.f32 %v4040_v60, %v1513_v25  ;;  %v1515_v32 = vpop.f32.mrb[54].mxu1  ;;  %1975 = vmatprep.mubr.bf16.mxu0 %v1705_v49  ;;  %2230 = vperm.xlu0 %3084, %v385_v58  }
 0x1c8   :  { %v1606_v35 = vadd.f32 %v4035_v62, %v1515_v32  ;;  %v1517_v33 = vpop.f32.mrb[55].mxu1  ;;  %1976 = vmatmul.mubr.bf16.gmra.mrb[80].mxu0 %v1704_v20  ;;  %v1668_v38 = vmax.f32 %v1604_v54, 0.0 }
 0x1c9   :  { %v1607_v24 = vadd.f32 %v4040_v60, %v1517_v33  ;;  %v1669_v44 = vmax.f32 %v1605_v52, 0.0 }
 0x1ca   :  { %v1670_v55 = vmax.f32 %v1606_v35, 0.0 }
 0x1cb   :  { %v1671_v31 = vmax.f32 %v1607_v24, 0.0 }
 0x1cc   :  { %v1706_v2 = vpack.c.bf16 %v1670_v55, %v1668_v38 }
 0x1cd   :  { %v1707_v47 = vpack.c.bf16 %v1671_v31, %v1669_v44  ;;  %v1521_v56 = vpop.f32.mrb[56].mxu1 }
 0x1ce   :  { %v1608_v59 = vadd.f32 %v4035_v62, %v1521_v56  ;;  %v1523_v36 = vpop.f32.mrb[57].mxu1 }
 0x1cf   :  { %v1609_v50 = vadd.f32 %v4040_v60, %v1523_v36  ;;  %v1525_v53 = vpop.f32.mrb[58].mxu1  ;;  %1983 = vmatprep.mubr.bf16.mxu0 %v1707_v47 }
 0x1d0   :  { %v1610_v34 = vadd.f32 %v4035_v62, %v1525_v53  ;;  %v1527_v39 = vpop.f32.mrb[59].mxu1  ;;  %1984 = vmatmul.mubr.bf16.gmra.mrb[84].mxu0 %v1706_v2  ;;  %v1672_v0 = vmax.f32 %v1608_v59, 0.0  ;;  %v4186_v53 = vpop.xlane.xlu1 %885 }
 0x1d1   :  { %v1611_v9 = vadd.f32 %v4040_v60, %v1527_v39  ;;  %v1673_v4 = vmax.f32 %v1609_v50, 0.0 }
 0x1d2   :  { %v1674_v1 = vmax.f32 %v1610_v34, 0.0 }
 0x1d3   :  { %v1675_v37 = vmax.f32 %v1611_v9, 0.0 }
 0x1d4   :  { %v1708_v5 = vpack.c.bf16 %v1674_v1, %v1672_v0 }
 0x1d5   :  { %v1709_v42 = vpack.c.bf16 %v1675_v37, %v1673_v4  ;;  %v1531_v7 = vpop.f32.mrb[60].mxu1 }
 0x1d6   :  { %v1612_v8 = vadd.f32 %v4035_v62, %v1531_v7  ;;  %v1533_v40 = vpop.f32.mrb[61].mxu1 }
 0x1d7   :  { %v1613_v18 = vadd.f32 %v4040_v60, %v1533_v40  ;;  %v1535_v3 = vpop.f32.mrb[62].mxu1  ;;  %1991 = vmatprep.mubr.bf16.mxu0 %v1709_v42 }
 0x1d8   :  { %v1614_v10 = vadd.f32 %v4035_v62, %v1535_v3  ;;  %v1537_v11 = vpop.f32.mrb[63].mxu1  ;;  %1992 = vmatmul.mubr.bf16.gmra.mrb[88].mxu0 %v1708_v5  ;;  %v1676_v13 = vmax.f32 %v1612_v8, 0.0  ;;  %v4190_v5 = vpop.xlane.xlu1 %891 }
 0x1d9   :  { %v1615_v12 = vadd.f32 %v4040_v60, %v1537_v11  ;;  %v1677_v14 = vmax.f32 %v1613_v18, 0.0 }
 0x1da   :  { %v1678_v19 = vmax.f32 %v1614_v10, 0.0 }
 0x1db   :  { %v1679_v45 = vmax.f32 %v1615_v12, 0.0 }
 0x1dc   :  { %v1710_v43 = vpack.c.bf16 %v1678_v19, %v1676_v13  ;;  %v4193_v19 = vpop.xlane.xlu1 %897 }
 0x1dd   :  { %v1711_v15 = vpack.c.bf16 %v1679_v45, %v1677_v14 }
 0x1df   :  { %1999 = vmatprep.mubr.bf16.mxu0 %v1711_v15 }
 0x1e0   :  { %2000 = vmatmul.mubr.bf16.gmra.mrb[92].mxu0 %v1710_v43 }
 0x23b   :  { %v2808_v16 = vpop.f32.mrb[32].mxu0 }
 0x23c   :  { %v2809_v17 = vpop.f32.mrb[33].mxu0 }
 0x23d   :  { %v2810_v62 = vadd.f32 %v2809_v17, %v2808_v16  ;;  %v2811_v46 = vpop.f32.mrb[34].mxu0 }
 0x23e   :  { %v2812_v48 = vpop.f32.mrb[35].mxu0 }
 0x23f   :  { %v1882_v60 = vadd.f32 %v2810_v62, %v4178_v29  ;;  %v2813_v22 = vadd.f32 %v2812_v48, %v2811_v46 }
 0x241   :  { %v1885_v51 = vadd.f32 %v2813_v22, %v4178_v29  ;;  %v2008_v20 = vmax.f32 %v1882_v60, 0.0  ;;  %v4196_v60 = vpop.xlane.xlu1 %903 }
 0x243   :  { %v2009_v21 = vmax.f32 %v1885_v51, 0.0  ;;  %v2814_v23 = vpop.f32.mrb[36].mxu0 }
 0x244   :  { %v2815_v49 = vpop.f32.mrb[37].mxu0 }
 0x245   :  { %v2816_v28 = vadd.f32 %v2815_v49, %v2814_v23  ;;  %v2817_v26 = vpop.f32.mrb[38].mxu0  ;;  %v2041_v54 = vpack.c.bf16 %v2009_v21, %v2008_v20  ;;  %v4200_v21 = vpop.xlane.xlu0 %870 }
 0x246   :  { %v2818_v25 = vpop.f32.mrb[39].mxu0 }
 0x247   :  { %v1890_v27 = vadd.f32 %v2816_v28, %v4178_v29  ;;  %v2819_v52 = vadd.f32 %v2818_v25, %v2817_v26  ;;  %2984 = vmatprep.mubr.bf16.mxu0 %v2041_v54  ;;  %v4202_v54 = vpop.xlane.xlu1 %909 }
 0x249   :  { %v1893_v32 = vadd.f32 %v2819_v52, %v4178_v29  ;;  %v2010_v35 = vmax.f32 %v1890_v27, 0.0 }
 0x24b   :  { %v2011_v33 = vmax.f32 %v1893_v32, 0.0  ;;  %v2820_v24 = vpop.f32.mrb[40].mxu0 }
 0x24c   :  { %v2821_v57 = vpop.f32.mrb[41].mxu0 }
 0x24d   :  { %v2042_v38 = vpack.c.bf16 %v2011_v33, %v2010_v35  ;;  %v2822_v55 = vadd.f32 %v2821_v57, %v2820_v24  ;;  %v2823_v58 = vpop.f32.mrb[42].mxu0  ;;  %v4205_v24 = vpop.xlane.xlu0 %876 }
 0x24e   :  { %v2824_v44 = vpop.f32.mrb[43].mxu0 }
 0x24f   :  { %v1898_v31 = vadd.f32 %v2822_v55, %v4178_v29  ;;  %v2825_v2 = vadd.f32 %v2824_v44, %v2823_v58  ;;  %2985 = vmatmul.mubr.bf16.vlgmr.msra.gmra.mrb[96].mxu0 %v2042_v38  ;;  %v4208_v38 = vpop.xlane.xlu1 %915 }
 0x251   :  { %v1901_v47 = vadd.f32 %v2825_v2, %v4178_v29  ;;  %v2012_v56 = vmax.f32 %v1898_v31, 0.0 }
 0x253   :  { %v2013_v59 = vmax.f32 %v1901_v47, 0.0  ;;  %v2826_v36 = vpop.f32.mrb[44].mxu0 }
 0x254   :  { %v2827_v50 = vpop.f32.mrb[45].mxu0 }
 0x255   :  { %v2828_v34 = vadd.f32 %v2827_v50, %v2826_v36  ;;  %v2829_v39 = vpop.f32.mrb[46].mxu0  ;;  %v2043_v9 = vpack.c.bf16 %v2013_v59, %v2012_v56  ;;  %v4210_v36 = vpop.xlane.xlu0 %882 }
 0x256   :  { %v2830_v0 = vpop.f32.mrb[47].mxu0 }
 0x257   :  { %v1906_v1 = vadd.f32 %v2828_v34, %v4178_v29  ;;  %v2831_v4 = vadd.f32 %v2830_v0, %v2829_v39  ;;  %2988 = vmatprep.mubr.bf16.mxu0 %v2043_v9  ;;  %v4213_v39 = vpop.xlane.xlu1 %921 }
 0x259   :  { %v1909_v37 = vadd.f32 %v2831_v4, %v4178_v29  ;;  %v2014_v42 = vmax.f32 %v1906_v1, 0.0 }
 0x25b   :  { %v2015_v7 = vmax.f32 %v1909_v37, 0.0  ;;  %v2832_v8 = vpop.f32.mrb[48].mxu0 }
 0x25c   :  { %v2833_v40 = vpop.f32.mrb[49].mxu0 }
 0x25d   :  { %v2834_v18 = vadd.f32 %v2833_v40, %v2832_v8  ;;  %v2835_v3 = vpop.f32.mrb[50].mxu0  ;;  %v2044_v10 = vpack.c.bf16 %v2015_v7, %v2014_v42  ;;  %v4216_v42 = vpop.xlane.xlu0 %888 }
 0x25e   :  { %v2836_v11 = vpop.f32.mrb[51].mxu0 }
 0x25f   :  { %v1914_v12 = vadd.f32 %v2834_v18, %v4178_v29  ;;  %v2837_v13 = vadd.f32 %v2836_v11, %v2835_v3  ;;  %2989 = vmatmul.mubr.bf16.gmra.mrb[100].mxu0 %v2044_v10  ;;  %v4218_v3 = vpop.xlane.xlu1 %927 }
 0x261   :  { %v1917_v14 = vadd.f32 %v2837_v13, %v4178_v29  ;;  %v2016_v45 = vmax.f32 %v1914_v12, 0.0  ;;  %v4222_v13 = vpop.xlane.xlu0 %894 }
 0x263   :  { %v2017_v43 = vmax.f32 %v1917_v14, 0.0  ;;  %v2838_v15 = vpop.f32.mrb[52].mxu0 }
 0x264   :  { %v2839_v16 = vpop.f32.mrb[53].mxu0 }
 0x265   :  { %v2840_v17 = vadd.f32 %v2839_v16, %v2838_v15  ;;  %v2841_v62 = vpop.f32.mrb[54].mxu0  ;;  %v2045_v46 = vpack.c.bf16 %v2017_v43, %v2016_v45  ;;  %v4224_v16 = vpop.xlane.xlu1 %933 }
 0x266   :  { %v2842_v48 = vpop.f32.mrb[55].mxu0  ;;  %4529 = vst [vmem:[#allocation6_spill] sm:$0xff] %v4224_v16 }
 0x267   :  { %v1922_v22 = vadd.f32 %v2840_v17, %v4178_v29  ;;  %v2843_v51 = vadd.f32 %v2842_v48, %v2841_v62  ;;  %2992 = vmatprep.mubr.bf16.mxu0 %v2045_v46 }
 0x269   :  { %v1925_v20 = vadd.f32 %v2843_v51, %v4178_v29  ;;  %v2018_v23 = vmax.f32 %v1922_v22, 0.0 }
 0x26b   :  { %v2019_v49 = vmax.f32 %v1925_v20, 0.0  ;;  %v2844_v28 = vpop.f32.mrb[56].mxu0  ;;  %v4227_v20 = vpop.xlane.xlu0 %900 }
 0x26c   :  { %v2845_v26 = vpop.f32.mrb[57].mxu0 }
 0x26d   :  { %v2846_v25 = vadd.f32 %v2845_v26, %v2844_v28  ;;  %v2847_v27 = vpop.f32.mrb[58].mxu0  ;;  %v2046_v52 = vpack.c.bf16 %v2019_v49, %v2018_v23  ;;  %v4230_v49 = vpop.xlane.xlu1 %939 }
 0x26e   :  { %v2848_v32 = vpop.f32.mrb[59].mxu0 }
 0x26f   :  { %v1930_v35 = vadd.f32 %v2846_v25, %v4178_v29  ;;  %v2849_v33 = vadd.f32 %v2848_v32, %v2847_v27  ;;  %2993 = vmatmul.mubr.bf16.gmra.mrb[104].mxu0 %v2046_v52 }
 0x271   :  { %v1933_v57 = vadd.f32 %v2849_v33, %v4178_v29  ;;  %v2020_v55 = vmax.f32 %v1930_v35, 0.0 }
 0x273   :  { %v2021_v58 = vmax.f32 %v1933_v57, 0.0  ;;  %v2850_v44 = vpop.f32.mrb[60].mxu0  ;;  %v4232_v57 = vpop.xlane.xlu0 %906 }
 0x274   :  { %v2851_v31 = vpop.f32.mrb[61].mxu0 }
 0x275   :  { %v2852_v2 = vadd.f32 %v2851_v31, %v2850_v44  ;;  %v2853_v47 = vpop.f32.mrb[62].mxu0  ;;  %v2047_v56 = vpack.c.bf16 %v2021_v58, %v2020_v55  ;;  %v4235_v44 = vpop.xlane.xlu1 %945 }
 0x276   :  { %v2854_v59 = vpop.f32.mrb[63].mxu0  ;;  %4530 = vst [vmem:[#allocation7_spill] sm:$0xff] %v4235_v44 }
 0x277   :  { %v1938_v50 = vadd.f32 %v2852_v2, %v4178_v29  ;;  %v2855_v34 = vadd.f32 %v2854_v59, %v2853_v47  ;;  %2996 = vmatprep.mubr.bf16.mxu0 %v2047_v56 }
 0x279   :  { %v1941_v9 = vadd.f32 %v2855_v34, %v4178_v29  ;;  %v2022_v0 = vmax.f32 %v1938_v50, 0.0  ;;  %v4238_v50 = vpop.xlane.xlu0 %912 }
 0x27b   :  { %v2023_v1 = vmax.f32 %v1941_v9, 0.0  ;;  %v2856_v4 = vpop.f32.mrb[64].mxu0 }
 0x27c   :  { %v2857_v37 = vpop.f32.mrb[65].mxu0 }
 0x27d   :  { %v2858_v7 = vadd.f32 %v2857_v37, %v2856_v4  ;;  %v2859_v8 = vpop.f32.mrb[66].mxu0  ;;  %v2048_v40 = vpack.c.bf16 %v2023_v1, %v2022_v0  ;;  %v4240_v4 = vpop.xlane.xlu1 %951 }
 0x27e   :  { %v2860_v18 = vpop.f32.mrb[67].mxu0  ;;  %4531 = vst [vmem:[#allocation8_spill] sm:$0xff] %v4240_v4 }
 0x27f   :  { %v1946_v10 = vadd.f32 %v2858_v7, %v4178_v29  ;;  %v2861_v11 = vadd.f32 %v2860_v18, %v2859_v8  ;;  %2997 = vmatmul.mubr.bf16.gmra.mrb[108].mxu0 %v2048_v40  ;;  %v4244_v40 = vpop.xlane.xlu0 %918 }
 0x281   :  { %v1949_v12 = vadd.f32 %v2861_v11, %v4178_v29  ;;  %v2024_v14 = vmax.f32 %v1946_v10, 0.0 }
 0x283   :  { %v2025_v45 = vmax.f32 %v1949_v12, 0.0  ;;  %v2862_v43 = vpop.f32.mrb[68].mxu0 }
 0x284   :  { %v2863_v15 = vpop.f32.mrb[69].mxu0 }
 0x285   :  { %v2864_v17 = vadd.f32 %v2863_v15, %v2862_v43  ;;  %v2865_v62 = vpop.f32.mrb[70].mxu0  ;;  %v2049_v46 = vpack.c.bf16 %v2025_v45, %v2024_v14  ;;  %v4246_v14 = vpop.xlane.xlu1 %957 }
 0x286   :  { %v2866_v48 = vpop.f32.mrb[71].mxu0  ;;  %4532 = vst [vmem:[#allocation9_spill] sm:$0xff] %v4246_v14 }
 0x287   :  { %v1954_v22 = vadd.f32 %v2864_v17, %v4178_v29  ;;  %v2867_v51 = vadd.f32 %v2866_v48, %v2865_v62  ;;  %3000 = vmatprep.mubr.bf16.mxu0 %v2049_v46  ;;  %v4249_v48 = vpop.xlane.xlu0 %924 }
 0x289   :  { %v1957_v23 = vadd.f32 %v2867_v51, %v4178_v29  ;;  %v2026_v28 = vmax.f32 %v1954_v22, 0.0  ;;  %v4252_v51 = vpop.xlane.xlu1 %963 }
 0x28a   :  { %4533 = vst [vmem:[#allocation10_spill] sm:$0xff] %v4252_v51 }
 0x28b   :  { %v2027_v26 = vmax.f32 %v1957_v23, 0.0  ;;  %v2868_v25 = vpop.f32.mrb[72].mxu0 }
 0x28c   :  { %v2869_v27 = vpop.f32.mrb[73].mxu0 }
 0x28d   :  { %v2870_v52 = vadd.f32 %v2869_v27, %v2868_v25  ;;  %v2871_v32 = vpop.f32.mrb[74].mxu0  ;;  %v2050_v35 = vpack.c.bf16 %v2027_v26, %v2026_v28 }
 0x28e   :  { %v2872_v33 = vpop.f32.mrb[75].mxu0 }
 0x28f   :  { %v1962_v55 = vadd.f32 %v2870_v52, %v4178_v29  ;;  %v2873_v58 = vadd.f32 %v2872_v33, %v2871_v32  ;;  %3001 = vmatmul.mubr.bf16.gmra.mrb[112].mxu0 %v2050_v35  ;;  %v4254_v33 = vpop.xlane.xlu0 %930 }
 0x291   :  { %v1965_v31 = vadd.f32 %v2873_v58, %v4178_v29  ;;  %v2028_v2 = vmax.f32 %v1962_v55, 0.0 }
 0x293   :  { %v2029_v47 = vmax.f32 %v1965_v31, 0.0  ;;  %v2874_v56 = vpop.f32.mrb[76].mxu0  ;;  %v4257_v31 = vpop.permute.xlu1 %2080 }
 0x294   :  { %v2875_v59 = vpop.f32.mrb[77].mxu0 }
 0x295   :  { %v2876_v34 = vadd.f32 %v2875_v59, %v2874_v56  ;;  %v2877_v9 = vpop.f32.mrb[78].mxu0  ;;  %v2051_v0 = vpack.c.bf16 %v2029_v47, %v2028_v2 }
 0x296   :  { %v2878_v1 = vpop.f32.mrb[79].mxu0 }
 0x297   :  { %v1970_v37 = vadd.f32 %v2876_v34, %v4178_v29  ;;  %v2879_v7 = vadd.f32 %v2878_v1, %v2877_v9  ;;  %3004 = vmatprep.mubr.bf16.mxu0 %v2051_v0  ;;  %v4260_v9 = vpop.xlane.xlu0 %936 }
 0x299   :  { %v1973_v8 = vadd.f32 %v2879_v7, %v4178_v29  ;;  %v2030_v18 = vmax.f32 %v1970_v37, 0.0 }
 0x29b   :  { %v2031_v10 = vmax.f32 %v1973_v8, 0.0  ;;  %v2880_v11 = vpop.f32.mrb[80].mxu0  ;;  %v4262_v8 = vpop.permute.xlu1 %2085 }
 0x29c   :  { %v2881_v12 = vpop.f32.mrb[81].mxu0 }
 0x29d   :  { %v2882_v45 = vadd.f32 %v2881_v12, %v2880_v11  ;;  %v2883_v43 = vpop.f32.mrb[82].mxu0  ;;  %v2052_v15 = vpack.c.bf16 %v2031_v10, %v2030_v18  ;;  %v4266_v12 = vpop.xlane.xlu0 %942 }
 0x29e   :  { %v2884_v17 = vpop.f32.mrb[83].mxu0  ;;  %4534 = vst [vmem:[#allocation11_spill] sm:$0xff] %v4266_v12 }
 0x29f   :  { %v1978_v62 = vadd.f32 %v2882_v45, %v4178_v29  ;;  %v2885_v46 = vadd.f32 %v2884_v17, %v2883_v43  ;;  %3005 = vmatmul.mubr.bf16.gmra.mrb[116].mxu0 %v2052_v15 }
 0x2a1   :  { %v1981_v22 = vadd.f32 %v2885_v46, %v4178_v29  ;;  %v2032_v23 = vmax.f32 %v1978_v62, 0.0  ;;  %v2091_v62 = vpop.permute.xlu1 %2090 }
 0x2a3   :  { %v2033_v28 = vmax.f32 %v1981_v22, 0.0  ;;  %v2886_v26 = vpop.f32.mrb[84].mxu0 }
 0x2a4   :  { %v2887_v25 = vpop.f32.mrb[85].mxu0 }
 0x2a5   :  { %v2888_v27 = vadd.f32 %v2887_v25, %v2886_v26  ;;  %v2889_v52 = vpop.f32.mrb[86].mxu0  ;;  %v2053_v32 = vpack.c.bf16 %v2033_v28, %v2032_v23 }
 0x2a6   :  { %v2890_v35 = vpop.f32.mrb[87].mxu0 }
 0x2a7   :  { %v1986_v55 = vadd.f32 %v2888_v27, %v4178_v29  ;;  %v2891_v58 = vadd.f32 %v2890_v35, %v2889_v52  ;;  %3008 = vmatprep.mubr.bf16.mxu0 %v2053_v32  ;;  %v4269_v27 = vpop.xlane.xlu0 %948  ;;  %v4272_v32 = vpop.permute.xlu1 %2095 }
 0x2a8   :  { %4535 = vst [vmem:[#allocation12_spill] sm:$0xff] %v4269_v27 }
 0x2a9   :  { %v1989_v2 = vadd.f32 %v2891_v58, %v4178_v29  ;;  %v2034_v47 = vmax.f32 %v1986_v55, 0.0 }
 0x2ab   :  { %v2035_v56 = vmax.f32 %v1989_v2, 0.0  ;;  %v2892_v59 = vpop.f32.mrb[88].mxu0  ;;  %v4274_v2 = vpop.xlane.xlu0 %954 }
 0x2ac   :  { %v2893_v34 = vpop.f32.mrb[89].mxu0  ;;  %4536 = vst [vmem:[#allocation13_spill] sm:$0xff] %v4274_v2 }
 0x2ad   :  { %v2894_v0 = vadd.f32 %v2893_v34, %v2892_v59  ;;  %v2895_v1 = vpop.f32.mrb[90].mxu0  ;;  %v2054_v37 = vpack.c.bf16 %v2035_v56, %v2034_v47  ;;  %v4276_v47 = vpop.permute.xlu1 %2100 }
 0x2ae   :  { %v2896_v7 = vpop.f32.mrb[91].mxu0 }
 0x2af   :  { %v1994_v18 = vadd.f32 %v2894_v0, %v4178_v29  ;;  %v2897_v10 = vadd.f32 %v2896_v7, %v2895_v1  ;;  %3009 = vmatmul.mubr.bf16.gmra.mrb[120].mxu0 %v2054_v37  ;;  %v4278_v56 = vpop.xlane.xlu0 %960 }
 0x2b0   :  { %4537 = vst [vmem:[#allocation14_spill] sm:$0xff] %v4278_v56 }
 0x2b1   :  { %v1997_v11 = vadd.f32 %v2897_v10, %v4178_v29  ;;  %v2036_v45 = vmax.f32 %v1994_v18, 0.0  ;;  %v4280_v59 = vpop.permute.xlu1 %2105 }
 0x2b3   :  { %v2037_v43 = vmax.f32 %v1997_v11, 0.0  ;;  %v2898_v15 = vpop.f32.mrb[92].mxu0  ;;  %v2076_v34 = vpop.permute.xlu0 %2075 }
 0x2b4   :  { %v2899_v17 = vpop.f32.mrb[93].mxu0 }
 0x2b5   :  { %v2900_v46 = vadd.f32 %v2899_v17, %v2898_v15  ;;  %v2901_v22 = vpop.f32.mrb[94].mxu0  ;;  %v2055_v23 = vpack.c.bf16 %v2037_v43, %v2036_v45  ;;  %v4282_v0 = vpop.permute.xlu1 %2110 }
 0x2b6   :  { %v2902_v28 = vpop.f32.mrb[95].mxu0 }
 0x2b7   :  { %v2002_v26 = vadd.f32 %v2900_v46, %v4178_v29  ;;  %v2903_v25 = vadd.f32 %v2902_v28, %v2901_v22  ;;  %3012 = vmatprep.mubr.bf16.mxu0 %v2055_v23  ;;  %v4284_v1 = vpop.permute.xlu0 %2120 }
 0x2b9   :  { %v2005_v52 = vadd.f32 %v2903_v25, %v4178_v29  ;;  %v2038_v35 = vmax.f32 %v2002_v26, 0.0  ;;  %v4286_v29 = vpop.permute.xlu1 %2115 }
 0x2bb   :  { %v2039_v55 = vmax.f32 %v2005_v52, 0.0  ;;  %v4288_v37 = vpop.permute.xlu0 %2130 }
 0x2bd   :  { %v2056_v58 = vpack.c.bf16 %v2039_v55, %v2038_v35  ;;  %v4290_v7 = vpop.permute.xlu1 %2125 }
 0x2bf   :  { %3013 = vmatmul.mubr.bf16.gmra.mrb[124].mxu0 %v2056_v58  ;;  %v4292_v18 = vpop.permute.xlu0 %2140 }
 0x2c1   :  { %v4294_v10 = vpop.permute.xlu1 %2135 }
 0x2c3   :  { %v4296_v11 = vpop.permute.xlu0 %2150 }
 0x2c5   :  { %v4298_v45 = vpop.permute.xlu1 %2145 }
 0x2c7   :  { %v4300_v43 = vpop.permute.xlu0 %2160 }
 0x2c9   :  { %v4302_v15 = vpop.permute.xlu1 %2155 }
 0x2cb   :  { %v4304_v17 = vpop.permute.xlu0 %2170 }
 0x2cd   :  { %v4306_v46 = vpop.permute.xlu1 %2165 }
 0x2cf   :  { %v4308_v22 = vpop.permute.xlu0 %2180 }
 0x2d0   :  { %4538 = vst [vmem:[#allocation15_spill] sm:$0xff] %v4308_v22 }
 0x2d1   :  { %v4310_v23 = vpop.permute.xlu1 %2175 }
 0x2d2   :  { %4539 = vst [vmem:[#allocation16_spill] sm:$0xff] %v4310_v23 }
 0x2d3   :  { %v4312_v28 = vpop.permute.xlu0 %2190 }
 0x2d4   :  { %4540 = vst [vmem:[#allocation17_spill] sm:$0xff] %v4312_v28 }
 0x2d5   :  { %v4314_v26 = vpop.permute.xlu1 %2185 }
 0x2d6   :  { %4541 = vst [vmem:[#allocation18_spill] sm:$0xff] %v4314_v26 }
 0x2d7   :  { %v4316_v25 = vpop.permute.xlu0 %2200 }
 0x2d8   :  { %4542 = vst [vmem:[#allocation19_spill] sm:$0xff] %v4316_v25  ;;  %v2040_v25 = vld [vmem:[%s4524_s12] sm:$0x3] }
 0x2d9   :  { %v4318_v52 = vpop.permute.xlu1 %2195 }
 0x2da   :  { %4543 = vst [vmem:[#allocation20_spill] sm:$0xff] %v4318_v52 }
 0x2db   :  { %v4320_v35 = vpop.permute.xlu0 %2210 }
 0x2dc   :  { %4544 = vst [vmem:[#allocation21_spill] sm:$0xff] %v4320_v35 }
 0x2dd   :  { %v4322_v55 = vpop.permute.xlu1 %2205 }
 0x2de   :  { %4545 = vst [vmem:[#allocation22_spill] sm:$0xff] %v4322_v55  ;;  %v4548_v55 = vsub.s32 0, %v4014_v6 }
 0x2df   :  { %v4324_v58 = vpop.permute.xlu0 %2220 }
 0x2e0   :  { %4546 = vst [vmem:[#allocation23_spill] sm:$0xff] %v4324_v58  ;;  %v4336_v44 = vrot.slane %v2040_v25, %v4548_v55 }
 0x2e1   :  { %v4326_v41 = vpop.permute.xlu1 %2215 }
 0x2e2   :  { %4547 = vst [vmem:[#allocation24_spill] sm:$0xff] %v4326_v41  ;;  %v4549_v41 = vsub.s32 1, %v4014_v6  ;;  %v2239_v12 = vmul.f32 %v4336_v44, %v4262_v8  ;;  %v2238_v6 = vmul.f32 %v4336_v44, %v4257_v31  ;;  %v4354_v8 = vld [vmem:[%s4525_s13] ss:$0 sm:$0xff]  ;;  %s3186_s13 = smov [#allocation3]  }
 0x2e3   :  { %v749_v30 = vpop.xlane.xlu0 %748  ;;  %s2654_s17 = sshll.u32 %s3186_s13, 4  ;;  %s2655_s17 = int_to_ptr.vmem [resolvable:$true] %s2654_s17 }
 0x2e4   :  { %v967_v2 = vsub.f32 %v749_v30, %v4205_v24  ;;  %v4341_v4 = vrot.slane %v2040_v25, %v4549_v41  ;;  %s3161_s18 = scalar_lea.vmem %s2655_s17, 4096  ;;  %p3166_p1 = scmp.lt.s32.totalorder %s2655_s17, %s2655_s17 }
 0x2e5   :  { %v752_v14 = vpop.xlane.xlu1 %751  ;;  %p3162_p0 = scmp.ne.s32.totalorder %s2655_s17, %s3161_s18  ;;  %p3167_p2 = scmp.lt.s32.totalorder %s3161_s18, %s3161_s18 }
 0x2e6   :  { %v968_v35 = vsub.f32 %v752_v14, %v4161_v63  ;;  %v999_v30 = vmul.f32 0.5, %v967_v2  ;;  %v2240_v14 = vmul.f32 %v4336_v44, %v2091_v62 }
 0x2e7   :  { %v743_v51 = vpop.xlane.xlu0 %742  ;;  %p3168_p3 = por %p3167_p2, %p3166_p1 }
 0x2e8   :  { %v965_v52 = vsub.f32 %v743_v51, %v4200_v21  ;;  %v1000_v27 = vmul.f32 0.5, %v968_v35  ;;  %v2237_v21 = vmul.f32 %v4336_v44, %v2076_v34  ;;  %v2484_v55 = vmul.f32 %v4341_v4, %v999_v30 }
 0x2e9   :  { %v746_v56 = vpop.xlane.xlu1 %745  ;;  %p3169_p4 = pnand %p3168_p3, %p3162_p0 }
 0x2ea   :  { %v966_v58 = vsub.f32 %v746_v56, %v4134_v61  ;;  %v997_v24 = vmul.f32 0.5, %v965_v52  ;;  %v2485_v25 = vmul.f32 %v4341_v4, %v1000_v27 }
 0x2eb   :  { %v761_v22 = vpop.xlane.xlu0 %760 }
 0x2ec   :  { %v998_v51 = vmul.f32 0.5, %v966_v58  ;;  %v2482_v41 = vmul.f32 %v4341_v4, %v997_v24 }
 0x2ed   :  { %v764_v62 = vpop.xlane.xlu1 %763 }
 0x2ef   :  { %v755_v26 = vpop.xlane.xlu0 %754 }
 0x322   :  { %v2986_v63 = vpop.f32.mrb[96].mxu0 }
 0x323   :  { %v2360_v61 = vadd.f32 %v2986_v63, %v2239_v12  ;;  %v2351_v56 = vpop.f32.mrb[97].mxu0  ;;  %v2483_v12 = vmul.f32 %v4341_v4, %v998_v51 }
 0x324   :  { %v2352_v2 = vadd.f32 %v2351_v56, %v2237_v21  ;;  %v2987_v34 = vpop.f32.mrb[98].mxu0 }
 0x325   :  { %v2516_v52 = vadd.f32 %v2484_v55, %v2360_v61  ;;  %v2363_v35 = vadd.f32 %v2987_v34, %v2240_v14  ;;  %v2354_v58 = vpop.f32.mrb[99].mxu0  ;;  %v971_v14 = vsub.f32 %v761_v22, %v4216_v42  ;;  %v758_v55 = vpop.xlane.xlu1 %757  ;;  %v969_v61 = vsub.f32 %v755_v26, %v4210_v36 }
 0x326   :  { %v2514_v30 = vadd.f32 %v2482_v41, %v2352_v2  ;;  %v2355_v63 = vadd.f32 %v2354_v58, %v2238_v6  ;;  %v972_v41 = vsub.f32 %v764_v62, %v4190_v5  ;;  %v970_v2 = vsub.f32 %v758_v55, %v4186_v53  ;;  %v773_v26 = vpop.xlane.xlu0 %772 }
 0x327   :  { %v2555_v31 = vadd.f32 %v4354_v8, %v2516_v52  ;;  %v2517_v24 = vadd.f32 %v2485_v25, %v2363_v35  ;;  %v1003_v34 = vmul.f32 0.5, %v971_v14  ;;  %v1001_v25 = vmul.f32 0.5, %v969_v61 }
 0x328   :  { %v2553_v28 = vadd.f32 %v4354_v8, %v2514_v30  ;;  %v2515_v23 = vadd.f32 %v2483_v12, %v2355_v63  ;;  %v2241_v42 = vmul.f32 %v4336_v44, %v4272_v32  ;;  %v2244_v36 = vmul.f32 %v4336_v44, %v4282_v0 }
 0x329   :  { %v2587_v16 = vmax.f32 %v2555_v31, 0.0  ;;  %v2556_v21 = vadd.f32 %v4354_v8, %v2517_v24  ;;  %v2488_v5 = vmul.f32 %v4341_v4, %v1003_v34  ;;  %v2242_v52 = vmul.f32 %v4336_v44, %v4276_v47  ;;  %v776_v32 = vpop.xlane.xlu1 %775 }
 0x32a   :  { %v2585_v56 = vmax.f32 %v2553_v28, 0.0  ;;  %v2554_v27 = vadd.f32 %v4354_v8, %v2515_v23  ;;  %v2243_v23 = vmul.f32 %v4336_v44, %v4280_v59  ;;  %v1004_v28 = vmul.f32 0.5, %v972_v41  ;;  %v767_v55 = vpop.xlane.xlu0 %766 }
 0x32b   :  { %2619 = vst [vmem:[#allocation3 + $0x10] sm:$0xff] %v2587_v16  ;;  %v2588_v51 = vmax.f32 %v2556_v21, 0.0  ;;  %v1002_v16 = vmul.f32 0.5, %v970_v2  ;;  %v2486_v35 = vmul.f32 %v4341_v4, %v1001_v25  ;;  %v975_v2 = vsub.f32 %v773_v26, %v4227_v20 }
 0x32c   :  { %2617 = vst [vmem:[#allocation3] sm:$0xff] %v2585_v56  ;;  %v2586_v6 = vmax.f32 %v2554_v27, 0.0  ;;  %v2489_v12 = vmul.f32 %v4341_v4, %v1004_v28  ;;  %v2245_v20 = vmul.f32 %v4336_v44, %v4286_v29 }
 0x32d   :  { %2620 = vst [vmem:[#allocation3 + $0x18] sm:$0xff] %v2588_v51  ;;  %v2487_v0 = vmul.f32 %v4341_v4, %v1002_v16  ;;  %v770_v34 = vpop.xlane.xlu1 %769 }
 0x32e   :  { %2618 = vst [vmem:[#allocation3 + $0x8] sm:$0xff] %v2586_v6  ;;  %v974_v16 = vsub.f32 %v770_v34, %v4193_v19 }
 0x330   :  { %v1006_v26 = vmul.f32 0.5, %v974_v16 }
 0x331   :  { %v788_v29 = vpop.xlane.xlu1 %787 }
 0x332   :  { %v2990_v22 = vpop.f32.mrb[100].mxu0 }
 0x333   :  { %v2376_v62 = vadd.f32 %v2990_v22, %v2243_v23  ;;  %v2367_v53 = vpop.f32.mrb[101].mxu0  ;;  %v973_v23 = vsub.f32 %v767_v55, %v4222_v13  ;;  %v1007_v22 = vmul.f32 0.5, %v975_v2  ;;  %v2248_v13 = vmul.f32 %v4336_v44, %v4288_v37 }
 0x334   :  { %v2368_v59 = vadd.f32 %v2367_v53, %v2241_v42  ;;  %v2991_v58 = vpop.f32.mrb[102].mxu0  ;;  %v976_v42 = vsub.f32 %v776_v32, %v4196_v60  ;;  %v2491_v37 = vmul.f32 %v4341_v4, %v1006_v26 }
 0x335   :  { %v2520_v30 = vadd.f32 %v2488_v5, %v2376_v62  ;;  %v2379_v63 = vadd.f32 %v2991_v58, %v2244_v36  ;;  %v2370_v31 = vpop.f32.mrb[103].mxu0  ;;  %v1005_v36 = vmul.f32 0.5, %v973_v23  ;;  %v2247_v5 = vmul.f32 %v4336_v44, %v4290_v7 }
 0x336   :  { %v2518_v24 = vadd.f32 %v2486_v35, %v2368_v59  ;;  %v2371_v21 = vadd.f32 %v2370_v31, %v2242_v52  ;;  %v1008_v62 = vmul.f32 0.5, %v976_v42  ;;  %v2492_v60 = vmul.f32 %v4341_v4, %v1007_v22  ;;  %v785_v52 = vpop.xlane.xlu0 %784 }
 0x337   :  { %v2559_v56 = vadd.f32 %v4354_v8, %v2520_v30  ;;  %v2521_v27 = vadd.f32 %v2489_v12, %v2379_v63  ;;  %v2246_v59 = vmul.f32 %v4336_v44, %v4284_v1  ;;  %v2490_v58 = vmul.f32 %v4341_v4, %v1005_v36 }
 0x338   :  { %v2557_v14 = vadd.f32 %v4354_v8, %v2518_v24  ;;  %v2519_v47 = vadd.f32 %v2487_v0, %v2371_v21  ;;  %v2493_v32 = vmul.f32 %v4341_v4, %v1008_v62  ;;  %v980_v23 = vsub.f32 %v788_v29, %v4208_v38 }
 0x339   :  { %v2591_v51 = vmax.f32 %v2559_v56, 0.0  ;;  %v2560_v61 = vadd.f32 %v4354_v8, %v2521_v27  ;;  %v2251_v22 = vmul.f32 %v4336_v44, %v4298_v45 }
 0x33a   :  { %v2589_v6 = vmax.f32 %v2557_v14, 0.0  ;;  %v2558_v41 = vadd.f32 %v4354_v8, %v2519_v47  ;;  %v779_v14 = vpop.xlane.xlu0 %778  ;;  %v1012_v36 = vmul.f32 0.5, %v980_v23  ;;  %v2254_v23 = vmul.f32 %v4336_v44, %v4300_v43 }
 0x33b   :  { %2623 = vst [vmem:[#allocation3 + $0x30] sm:$0xff] %v2591_v51  ;;  %v2592_v25 = vmax.f32 %v2560_v61, 0.0  ;;  %v977_v34 = vsub.f32 %v779_v14, %v4232_v57  ;;  %v2252_v57 = vmul.f32 %v4336_v44, %v4296_v11 }
 0x33c   :  { %2621 = vst [vmem:[#allocation3 + $0x20] sm:$0xff] %v2589_v6  ;;  %v2590_v28 = vmax.f32 %v2558_v41, 0.0  ;;  %v979_v6 = vsub.f32 %v785_v52, %v4238_v50  ;;  %v782_v41 = vpop.xlane.xlu1 %781  ;;  %v2249_v50 = vmul.f32 %v4336_v44, %v4294_v10  ;;  %v2497_v52 = vmul.f32 %v4341_v4, %v1012_v36 }
 0x33d   :  { %2624 = vst [vmem:[#allocation3 + $0x38] sm:$0xff] %v2592_v25  ;;  %v1009_v16 = vmul.f32 0.5, %v977_v34 }
 0x33e   :  { %2622 = vst [vmem:[#allocation3 + $0x28] sm:$0xff] %v2590_v28  ;;  %v978_v28 = vsub.f32 %v782_v41, %v4202_v54  ;;  %v1011_v42 = vmul.f32 0.5, %v979_v6 }
 0x340   :  { %v2496_v38 = vmul.f32 %v4341_v4, %v1011_v42  ;;  %v800_v10 = vpop.xlane.xlu1 %799 }
 0x341   :  { %v984_v14 = vsub.f32 %v800_v10, %v4218_v3 }
 0x342   :  { %v2994_v53 = vpop.f32.mrb[104].mxu0 }
 0x343   :  { %v2392_v35 = vadd.f32 %v2994_v53, %v2247_v5  ;;  %v2383_v19 = vpop.f32.mrb[105].mxu0  ;;  %v1010_v5 = vmul.f32 0.5, %v978_v28  ;;  %v2250_v53 = vmul.f32 %v4336_v44, %v4292_v18  ;;  %v1016_v6 = vmul.f32 0.5, %v984_v14 }
 0x344   :  { %v2384_v7 = vadd.f32 %v2383_v19, %v2245_v20  ;;  %v2995_v12 = vpop.f32.mrb[106].mxu0  ;;  %v797_v20 = vpop.xlane.xlu0 %796 }
 0x345   :  { %v2524_v30 = vadd.f32 %v2492_v60, %v2392_v35  ;;  %v2395_v63 = vadd.f32 %v2995_v12, %v2248_v13  ;;  %v2386_v31 = vpop.f32.mrb[107].mxu0  ;;  %v2494_v13 = vmul.f32 %v4341_v4, %v1009_v16  ;;  %v2495_v11 = vmul.f32 %v4341_v4, %v1010_v5 }
 0x346   :  { %v2522_v0 = vadd.f32 %v2490_v58, %v2384_v7  ;;  %v2387_v24 = vadd.f32 %v2386_v31, %v2246_v59  ;;  %v2501_v16 = vmul.f32 %v4341_v4, %v1016_v6 }
 0x347   :  { %v2563_v21 = vadd.f32 %v4354_v8, %v2524_v30  ;;  %v2525_v56 = vadd.f32 %v2493_v32, %v2395_v63 }
 0x348   :  { %v2561_v27 = vadd.f32 %v4354_v8, %v2522_v0  ;;  %v2523_v1 = vadd.f32 %v2491_v37, %v2387_v24  ;;  %v791_v30 = vpop.xlane.xlu0 %790  ;;  %v983_v24 = vsub.f32 %v797_v20, %v4249_v48  ;;  %v2253_v48 = vmul.f32 %v4336_v44, %v4302_v15 }
 0x349   :  { %v2595_v47 = vmax.f32 %v2563_v21, 0.0  ;;  %v2564_v55 = vadd.f32 %v4354_v8, %v2525_v56  ;;  %v794_v21 = vpop.xlane.xlu1 %793 }
 0x34a   :  { %v2593_v51 = vmax.f32 %v2561_v27, 0.0  ;;  %v2562_v61 = vadd.f32 %v4354_v8, %v2523_v1  ;;  %v981_v27 = vsub.f32 %v791_v30, %v4244_v40  ;;  %v2256_v40 = vmul.f32 %v4336_v44, %v4304_v17 }
 0x34b   :  { %2627 = vst [vmem:[#allocation3 + $0x50] sm:$0xff] %v2595_v47  ;;  %v2596_v2 = vmax.f32 %v2564_v55, 0.0  ;;  %v982_v47 = vsub.f32 %v794_v21, %v4213_v39  ;;  %v1015_v55 = vmul.f32 0.5, %v983_v24 }
 0x34c   :  { %2625 = vst [vmem:[#allocation3 + $0x40] sm:$0xff] %v2593_v51  ;;  %v2594_v25 = vmax.f32 %v2562_v61, 0.0  ;;  %v1013_v51 = vmul.f32 0.5, %v981_v27  ;;  %v2255_v61 = vmul.f32 %v4336_v44, %v4306_v46  ;;  %v809_v34 = vpop.xlane.xlu0 %808 }
 0x34d   :  { %2628 = vst [vmem:[#allocation3 + $0x58] sm:$0xff] %v2596_v2  ;;  %v1014_v41 = vmul.f32 0.5, %v982_v47  ;;  %v2500_v3 = vmul.f32 %v4341_v4, %v1015_v55  ;;  %v812_v15 = vpop.xlane.xlu1 %811 }
 0x34e   :  { %2626 = vst [vmem:[#allocation3 + $0x48] sm:$0xff] %v2594_v25  ;;  %v2498_v28 = vmul.f32 %v4341_v4, %v1013_v51 }
 0x34f   :  { %v2499_v17 = vmul.f32 %v4341_v4, %v1014_v41 }
 0x352   :  { %v2998_v62 = vpop.f32.mrb[108].mxu0 }
 0x353   :  { %v2408_v26 = vadd.f32 %v2998_v62, %v2251_v22  ;;  %v2399_v54 = vpop.f32.mrb[109].mxu0 }
 0x354   :  { %v2400_v45 = vadd.f32 %v2399_v54, %v2249_v50  ;;  %v2999_v60 = vpop.f32.mrb[110].mxu0 }
 0x355   :  { %v2528_v35 = vadd.f32 %v2496_v38, %v2408_v26  ;;  %v2411_v19 = vadd.f32 %v2999_v60, %v2252_v57  ;;  %v2402_v59 = vpop.f32.mrb[111].mxu0  ;;  %v803_v26 = vpop.xlane.xlu0 %802  ;;  %v987_v60 = vsub.f32 %v809_v34, %v4260_v9  ;;  %v4552_v9 = vld [vmem:[#allocation16_spill] sm:$0xff] }
 0x356   :  { %v2526_v58 = vadd.f32 %v2494_v13, %v2400_v45  ;;  %v2403_v7 = vadd.f32 %v2402_v59, %v2250_v53  ;;  %v988_v59 = vsub.f32 %v812_v15, %v4230_v49  ;;  %v2257_v30 = vmul.f32 %v4336_v44, %v4552_v9  ;;  %v4555_v15 = vld [vmem:[#allocation12_spill] sm:$0xff] }
 0x357   :  { %v2567_v12 = vadd.f32 %v4354_v8, %v2528_v35  ;;  %v2529_v32 = vadd.f32 %v2497_v52, %v2411_v19  ;;  %v806_v52 = vpop.xlane.xlu1 %805  ;;  %v985_v35 = vsub.f32 %v803_v26, %v4254_v33  ;;  %v4553_v33 = vld [vmem:[#allocation17_spill] sm:$0xff] }
 0x358   :  { %v2565_v29 = vadd.f32 %v4354_v8, %v2526_v58  ;;  %v2527_v18 = vadd.f32 %v2495_v11, %v2403_v7  ;;  %v4550_v11 = vld [vmem:[#allocation6_spill] sm:$0xff]  ;;  %v1019_v7 = vmul.f32 0.5, %v987_v60  ;;  %v4560_v60 = vld [vmem:[#allocation20_spill] sm:$0xff] }
 0x359   :  { %v2599_v63 = vmax.f32 %v2567_v12, 0.0  ;;  %v2568_v31 = vadd.f32 %v4354_v8, %v2529_v32  ;;  %v986_v58 = vsub.f32 %v806_v52, %v4550_v11  ;;  %v1017_v12 = vmul.f32 0.5, %v985_v35  ;;  %v4551_v32 = vld [vmem:[#allocation18_spill] sm:$0xff] }
 0x35a   :  { %v2597_v37 = vmax.f32 %v2565_v29, 0.0  ;;  %v2566_v0 = vadd.f32 %v4354_v8, %v2527_v18  ;;  %v2259_v29 = vmul.f32 %v4336_v44, %v4551_v32  ;;  %v1020_v18 = vmul.f32 0.5, %v988_v59  ;;  %v4562_v32 = vld [vmem:[#allocation19_spill] sm:$0xff] }
 0x35b   :  { %2631 = vst [vmem:[#allocation3 + $0x70] sm:$0xff] %v2599_v63  ;;  %v2600_v56 = vmax.f32 %v2568_v31, 0.0  ;;  %v1018_v63 = vmul.f32 0.5, %v986_v58  ;;  %v2504_v49 = vmul.f32 %v4341_v4, %v1019_v7  ;;  %v824_v51 = vpop.xlane.xlu1 %823  ;;  %v2261_v52 = vmul.f32 %v4336_v44, %v4560_v60 }
 0x35c   :  { %2629 = vst [vmem:[#allocation3 + $0x60] sm:$0xff] %v2597_v37  ;;  %v2598_v1 = vmax.f32 %v2566_v0, 0.0  ;;  %v2260_v37 = vmul.f32 %v4336_v44, %v4553_v33  ;;  %v821_v0 = vpop.xlane.xlu0 %820  ;;  %v2505_v55 = vmul.f32 %v4341_v4, %v1020_v18 }
 0x35d   :  { %2632 = vst [vmem:[#allocation3 + $0x78] sm:$0xff] %v2600_v56  ;;  %v4554_v56 = vld [vmem:[#allocation15_spill] sm:$0xff]  ;;  %v2503_v41 = vmul.f32 %v4341_v4, %v1018_v63 }
 0x35e   :  { %2630 = vst [vmem:[#allocation3 + $0x68] sm:$0xff] %v2598_v1  ;;  %v2258_v27 = vmul.f32 %v4336_v44, %v4554_v56  ;;  %v2502_v1 = vmul.f32 %v4341_v4, %v1017_v12 }
 0x362   :  { %v3002_v2 = vpop.f32.mrb[112].mxu0 }
 0x363   :  { %v2424_v25 = vadd.f32 %v3002_v2, %v2255_v61  ;;  %v2415_v39 = vpop.f32.mrb[113].mxu0 }
 0x364   :  { %v2416_v46 = vadd.f32 %v2415_v39, %v2253_v48  ;;  %v3003_v42 = vpop.f32.mrb[114].mxu0 }
 0x365   :  { %v2532_v22 = vadd.f32 %v2500_v3, %v2424_v25  ;;  %v2427_v36 = vadd.f32 %v3003_v42, %v2256_v40  ;;  %v2418_v50 = vpop.f32.mrb[115].mxu0 }
 0x366   :  { %v2530_v5 = vadd.f32 %v2498_v28, %v2416_v46  ;;  %v2419_v62 = vadd.f32 %v2418_v50, %v2254_v23  ;;  %v815_v23 = vpop.xlane.xlu0 %814 }
 0x367   :  { %v2571_v57 = vadd.f32 %v4354_v8, %v2532_v22  ;;  %v2533_v38 = vadd.f32 %v2501_v16, %v2427_v36  ;;  %v991_v22 = vsub.f32 %v821_v0, %v4555_v15  ;;  %v818_v36 = vpop.xlane.xlu1 %817 }
 0x368   :  { %v2569_v20 = vadd.f32 %v4354_v8, %v2530_v5  ;;  %v2531_v43 = vadd.f32 %v2499_v17, %v2419_v62  ;;  %v4556_v17 = vld [vmem:[#allocation11_spill] sm:$0xff] }
 0x369   :  { %v2603_v54 = vmax.f32 %v2571_v57, 0.0  ;;  %v2572_v53 = vadd.f32 %v4354_v8, %v2533_v38  ;;  %v989_v5 = vsub.f32 %v815_v23, %v4556_v17  ;;  %v4557_v57 = vld [vmem:[#allocation8_spill] sm:$0xff]  ;;  %v1023_v26 = vmul.f32 0.5, %v991_v22 }
 0x36a   :  { %v2601_v13 = vmax.f32 %v2569_v20, 0.0  ;;  %v2570_v45 = vadd.f32 %v4354_v8, %v2531_v43  ;;  %v992_v38 = vsub.f32 %v824_v51, %v4557_v57  ;;  %v4558_v20 = vld [vmem:[#allocation7_spill] sm:$0xff]  ;;  %v833_v58 = vpop.xlane.xlu0 %832  ;;  %v4567_v17 = vld [vmem:[#allocation24_spill] sm:$0xff] }
 0x36b   :  { %2635 = vst [vmem:[#allocation3 + $0x90] sm:$0xff] %v2603_v54  ;;  %v2604_v10 = vmax.f32 %v2572_v53, 0.0  ;;  %v990_v43 = vsub.f32 %v818_v36, %v4558_v20  ;;  %v1021_v54 = vmul.f32 0.5, %v989_v5  ;;  %v4559_v53 = vld [vmem:[#allocation22_spill] sm:$0xff]  ;;  %v2508_v11 = vmul.f32 %v4341_v4, %v1023_v26  ;;  %v836_v9 = vpop.xlane.xlu1 %835 }
 0x36c   :  { %2633 = vst [vmem:[#allocation3 + $0x80] sm:$0xff] %v2601_v13  ;;  %v2602_v19 = vmax.f32 %v2570_v45, 0.0  ;;  %v2263_v13 = vmul.f32 %v4336_v44, %v4559_v53  ;;  %v1024_v45 = vmul.f32 0.5, %v992_v38  ;;  %v2265_v5 = vmul.f32 %v4336_v44, %v4567_v17 }
 0x36d   :  { %2636 = vst [vmem:[#allocation3 + $0x98] sm:$0xff] %v2604_v10  ;;  %v1022_v10 = vmul.f32 0.5, %v990_v43  ;;  %v2506_v18 = vmul.f32 %v4341_v4, %v1021_v54  ;;  %v4568_v54 = vld [vmem:[#allocation23_spill] sm:$0xff] }
 0x36e   :  { %2634 = vst [vmem:[#allocation3 + $0x88] sm:$0xff] %v2602_v19  ;;  %v4561_v19 = vld [vmem:[#allocation21_spill] sm:$0xff]  ;;  %v2266_v53 = vmul.f32 %v4336_v44, %v4568_v54 }
 0x36f   :  { %v2264_v59 = vmul.f32 %v4336_v44, %v4561_v19  ;;  %v2507_v0 = vmul.f32 %v4341_v4, %v1022_v10 }
 0x372   :  { %v3006_v31 = vpop.f32.mrb[116].mxu0 }
 0x373   :  { %v2440_v24 = vadd.f32 %v3006_v31, %v2259_v29  ;;  %v2431_v21 = vpop.f32.mrb[117].mxu0  ;;  %v2262_v29 = vmul.f32 %v4336_v44, %v4562_v32  ;;  %v2509_v31 = vmul.f32 %v4341_v4, %v1024_v45 }
 0x374   :  { %v2432_v14 = vadd.f32 %v2431_v21, %v2257_v30  ;;  %v3007_v47 = vpop.f32.mrb[118].mxu0 }
 0x375   :  { %v2536_v61 = vadd.f32 %v2504_v49, %v2440_v24  ;;  %v2443_v6 = vadd.f32 %v3007_v47, %v2260_v37  ;;  %v2434_v48 = vpop.f32.mrb[119].mxu0  ;;  %v827_v47 = vpop.xlane.xlu0 %826 }
 0x376   :  { %v2534_v2 = vadd.f32 %v2502_v1, %v2432_v14  ;;  %v2435_v40 = vadd.f32 %v2434_v48, %v2258_v27 }
 0x377   :  { %v2575_v3 = vadd.f32 %v4354_v8, %v2536_v61  ;;  %v2537_v34 = vadd.f32 %v2505_v55, %v2443_v6  ;;  %v830_v61 = vpop.xlane.xlu1 %829 }
 0x378   :  { %v2573_v25 = vadd.f32 %v4354_v8, %v2534_v2  ;;  %v2535_v39 = vadd.f32 %v2503_v41, %v2435_v40  ;;  %v4563_v41 = vld [vmem:[#allocation14_spill] sm:$0xff] }
 0x379   :  { %v2607_v28 = vmax.f32 %v2575_v3, 0.0  ;;  %v2576_v46 = vadd.f32 %v4354_v8, %v2537_v34  ;;  %v995_v2 = vsub.f32 %v833_v58, %v4563_v41  ;;  %v4564_v3 = vld [vmem:[#allocation13_spill] sm:$0xff]  ;;  %v2231_v22 = vpop.permute.xlu0 %2230 }
 0x37a   :  { %v2605_v42 = vmax.f32 %v2573_v25, 0.0  ;;  %v2574_v16 = vadd.f32 %v4354_v8, %v2535_v39  ;;  %v993_v34 = vsub.f32 %v827_v47, %v4564_v3  ;;  %v4565_v39 = vld [vmem:[#allocation10_spill] sm:$0xff]  ;;  %v2268_v20 = vmul.f32 %v4336_v44, %v2231_v22 }
 0x37b   :  { %2639 = vst [vmem:[#allocation3 + $0xb0] sm:$0xff] %v2607_v28  ;;  %v2608_v50 = vmax.f32 %v2576_v46, 0.0  ;;  %v996_v23 = vsub.f32 %v836_v9, %v4565_v39  ;;  %v4566_v28 = vld [vmem:[#allocation9_spill] sm:$0xff] }
 0x37c   :  { %2637 = vst [vmem:[#allocation3 + $0xa0] sm:$0xff] %v2605_v42  ;;  %v2606_v62 = vmax.f32 %v2574_v16, 0.0  ;;  %v994_v46 = vsub.f32 %v830_v61, %v4566_v28  ;;  %v2226_v42 = vpop.permute.xlu1 %2225  ;;  %v1027_v16 = vmul.f32 0.5, %v995_v2  ;;  %v1025_v15 = vmul.f32 0.5, %v993_v34 }
 0x37d   :  { %2640 = vst [vmem:[#allocation3 + $0xb8] sm:$0xff] %v2608_v50  ;;  %v1028_v36 = vmul.f32 0.5, %v996_v23  ;;  %v2267_v50 = vmul.f32 %v4336_v44, %v2226_v42 }
 0x37e   :  { %2638 = vst [vmem:[#allocation3 + $0xa8] sm:$0xff] %v2606_v62  ;;  %v1026_v62 = vmul.f32 0.5, %v994_v46  ;;  %v2512_v38 = vmul.f32 %v4341_v4, %v1027_v16 }
 0x382   :  { %v3010_v35 = vpop.f32.mrb[120].mxu0 }
 0x383   :  { %v2456_v7 = vadd.f32 %v3010_v35, %v2263_v13  ;;  %v2447_v12 = vpop.f32.mrb[121].mxu0  ;;  %v2510_v13 = vmul.f32 %v4341_v4, %v1025_v15 }
 0x384   :  { %v2448_v30 = vadd.f32 %v2447_v12, %v2261_v52  ;;  %v3011_v63 = vpop.f32.mrb[122].mxu0  ;;  %v2513_v52 = vmul.f32 %v4341_v4, %v1028_v36 }
 0x385   :  { %v2540_v33 = vadd.f32 %v2508_v11, %v2456_v7  ;;  %v2459_v37 = vadd.f32 %v3011_v63, %v2264_v59  ;;  %v2450_v49 = vpop.f32.mrb[123].mxu0  ;;  %v2511_v59 = vmul.f32 %v4341_v4, %v1026_v62 }
 0x386   :  { %v2538_v24 = vadd.f32 %v2506_v18, %v2448_v30  ;;  %v2451_v21 = vadd.f32 %v2450_v49, %v2262_v29 }
 0x387   :  { %v2579_v56 = vadd.f32 %v4354_v8, %v2540_v33  ;;  %v2541_v27 = vadd.f32 %v2509_v31, %v2459_v37 }
 0x388   :  { %v2577_v1 = vadd.f32 %v4354_v8, %v2538_v24  ;;  %v2539_v14 = vadd.f32 %v2507_v0, %v2451_v21 }
 0x389   :  { %v2611_v55 = vmax.f32 %v2579_v56, 0.0  ;;  %v2580_v51 = vadd.f32 %v4354_v8, %v2541_v27 }
 0x38a   :  { %v2609_v6 = vmax.f32 %v2577_v1, 0.0  ;;  %v2578_v48 = vadd.f32 %v4354_v8, %v2539_v14 }
 0x38b   :  { %2643 = vst [vmem:[#allocation3 + $0xd0] sm:$0xff] %v2611_v55  ;;  %v2612_v40 = vmax.f32 %v2580_v51, 0.0 }
 0x38c   :  { %2641 = vst [vmem:[#allocation3 + $0xc0] sm:$0xff] %v2609_v6  ;;  %v2610_v25 = vmax.f32 %v2578_v48, 0.0 }
 0x38d   :  { %2644 = vst [vmem:[#allocation3 + $0xd8] sm:$0xff] %v2612_v40 }
 0x38e   :  { %2642 = vst [vmem:[#allocation3 + $0xc8] sm:$0xff] %v2610_v25 }
 0x392   :  { %v3014_v57 = vpop.f32.mrb[124].mxu0 }
 0x393   :  { %v2472_v43 = vadd.f32 %v3014_v57, %v2267_v50  ;;  %v2463_v26 = vpop.f32.mrb[125].mxu0 }
 0x394   :  { %v2464_v45 = vadd.f32 %v2463_v26, %v2265_v5  ;;  %v3015_v60 = vpop.f32.mrb[126].mxu0 }
 0x395   :  { %v2544_v10 = vadd.f32 %v2512_v38, %v2472_v43  ;;  %v2475_v35 = vadd.f32 %v3015_v60, %v2268_v20  ;;  %v2466_v19 = vpop.f32.mrb[127].mxu0 }
 0x396   :  { %v2542_v11 = vadd.f32 %v2510_v13, %v2464_v45  ;;  %v2467_v58 = vadd.f32 %v2466_v19, %v2266_v53 }
 0x397   :  { %v2583_v7 = vadd.f32 %v4354_v8, %v2544_v10  ;;  %v2545_v12 = vadd.f32 %v2513_v52, %v2475_v35 }
 0x398   :  { %v2581_v32 = vadd.f32 %v4354_v8, %v2542_v11  ;;  %v2543_v29 = vadd.f32 %v2511_v59, %v2467_v58 }
 0x399   :  { %v2615_v44 = vmax.f32 %v2583_v7, 0.0  ;;  %v2584_v18 = vadd.f32 %v4354_v8, %v2545_v12 }
 0x39a   :  { %v2613_v9 = vmax.f32 %v2581_v32, 0.0  ;;  %v2582_v30 = vadd.f32 %v4354_v8, %v2543_v29 }
 0x39b   :  { %2647 = vst [vmem:[#allocation3 + $0xf0] sm:$0xff] %v2615_v44  ;;  %v2616_v63 = vmax.f32 %v2584_v18, 0.0 }
 0x39c   :  { %2645 = vst [vmem:[#allocation3 + $0xe0] sm:$0xff] %v2613_v9  ;;  %v2614_v4 = vmax.f32 %v2582_v30, 0.0 }
 0x39d   :  { %2648 = vst [vmem:[#allocation3 + $0xf8] sm:$0xff] %v2616_v63 }
 0x39e   :  { %2646 = vst [vmem:[#allocation3 + $0xe8] sm:$0xff] %v2614_v4 }
 0x39f   :  { %3172 = shalt.err (!%p3169_p4)
}
 0x3a0   :  { %s3173_s20 = scalar_lea.hbm %s4526_s14, 4096 }
 0x3a1   :  { %p3174_p5 = scmp.ne.s32.totalorder %s4526_s14, %s3173_s20  ;;  %p3177_p6 = scmp.lt.u32.totalorder %s3173_s20, %s4526_s14 }
 0x3a3   :  { %p3179_p7 = pnand %p3177_p6, %p3174_p5 }
 0x3a5   :  { %3182 = shalt.err (!%p3179_p7)
}
 0x3a6   :  { %s3187_s23 = smov 128   ;;  %s3188_s1 = smov 8  }
 0x3a7   :  { %2660 = dma.vmem_to_hbm [thread:$0]  %s2655_s17, 4096, %s4526_s14, [#allocation4], %s3187_s23, %s3187_s23, %s3188_s1  }
 0x3a8   :  { %3183 = dma.done.wait [#allocation4], 4096  }
 0x3a9   :  { %3184 = vsyncadd [#allocation4], 4294963200 }
 0x3aa   :  { %2664 = vsyncpa [#allocation4], 1 }

</bundles_post_ra>
